<compile_context>
chip_gen: v5e
topology: v5e:2x2
jax: 0.10.0
libtpu: 0.0.40
codegen_flags: <defaults>
</compile_context>

<pallas_src>
import functools
import math

import numpy as np
import jax
import jax.numpy as jnp
from jax.experimental import pallas as pl
from jax.experimental.pallas import tpu as pltpu


# ----------------------------- in-kernel helpers -----------------------------

def _erf(x):
    # Numerical-Recipes erfc rational approximation (|rel err| < 1.2e-7): exact-gelu grade in f32.
    # TODO(synk): on v5e this polynomial is pure VALU filler; swap for lax.erf / tanh-gelu if the
    # Mosaic build provides an erf lowering.
    ax = jnp.abs(x)
    t = 1.0 / (1.0 + 0.5 * ax)
    poly = -1.26551223 + t * (1.00002368 + t * (0.37409196 + t * (0.09678418 +
           t * (-0.18628806 + t * (0.27886807 + t * (-1.13520398 + t * (1.48851587 +
           t * (-0.82215223 + t * 0.17087277))))))))
    erfc_pos = t * jnp.exp(-ax * ax + poly)
    erfc_val = jnp.where(x >= 0, erfc_pos, 2.0 - erfc_pos)
    return 1.0 - erfc_val


def _gelu_exact(x):
    # matches torch.nn.functional.gelu (erf-based, not tanh approximation)
    return 0.5 * x * (1.0 + _erf(x * 0.7071067811865476))


def _layernorm(z, g, b, eps=1e-5):
    # PyTorch LayerNorm semantics: biased variance, eps=1e-5
    mu = jnp.mean(z, axis=-1, keepdims=True)
    var = jnp.mean((z - mu) ** 2, axis=-1, keepdims=True)
    return (z - mu) * jax.lax.rsqrt(var + eps) * g + b


# --------------------------------- kernel -----------------------------------

def _st_encoder_kernel(x_ref, pos_ref, hmask_ref,
                       wq_ref, wk_ref, wv_ref, bq_ref, bk_ref, bv_ref,
                       wo_ref, bo_ref, g1_ref, b1_ref,
                       w1_ref, bf1_ref, w2_ref, bf2_ref, g2_ref, b2_ref,
                       gf_ref, bf_ref, o_ref, *, num_layers, nhead, scale):
    # One batch element end-to-end: pos add + all encoder layers + final LayerNorm.
    x = x_ref[0] + pos_ref[0]                     # (T, C) f32 tokens, pos added
    T, C = x.shape
    hmask = hmask_ref[...]                        # (H, 1, C) f32 per-head column mask

    for l in range(num_layers):                   # static: layers are sequential anyway
        xb = x.astype(jnp.bfloat16)               # bf16 operands, f32 accumulation on MXU

        # ---- fused projections: one (T,C)x(C,C) matmul each for Q, K, V ----
        q = jnp.dot(xb, wq_ref[l], preferred_element_type=jnp.float32) + bq_ref[l]
        k = jnp.dot(xb, wk_ref[l], preferred_element_type=jnp.float32) + bk_ref[l]
        v = jnp.dot(xb, wv_ref[l], preferred_element_type=jnp.float32) + bv_ref[l]

        # ---- all heads at once (no per-head unroll, no lane slicing) ----
        # mask Q's columns per head and stack heads along the sublane axis:
        #   s[h*T+i, j] = sum_d q[i, h*dh+d] * k[j, h*dh+d]   (one MXU push for all heads)
        q_sel = (q * hmask).reshape(nhead * T, C)                       # (H*T, C)
        s = jax.lax.dot_general(q_sel, k, (((1,), (1,)), ((), ())),
                                preferred_element_type=jnp.float32) * scale  # (H*T, T)
        m = jnp.max(s, axis=-1, keepdims=True)
        p = jnp.exp(s - m)
        p = p / jnp.sum(p, axis=-1, keepdims=True)                      # exact divide (parity)
        o_sel = jnp.dot(p, v, preferred_element_type=jnp.float32)       # (H*T, C)
        # keep only head h's columns for rows of head h, then collapse heads -> concat(head outs)
        ctx = jnp.sum(o_sel.reshape(nhead, T, C) * hmask, axis=0)       # (T, C)
        sa = jnp.dot(ctx.astype(jnp.bfloat16), wo_ref[l],
                     preferred_element_type=jnp.float32) + bo_ref[l]    # out_proj

        # ---- residual + LayerNorm1 (norm_first=False) ----
        x1 = _layernorm(x + sa, g1_ref[l], b1_ref[l])

        # ---- feed-forward: linear2(gelu(linear1(x1))) ----
        h1 = jnp.dot(x1.astype(jnp.bfloat16), w1_ref[l],
                     preferred_element_type=jnp.float32) + bf1_ref[l]
        h1 = _gelu_exact(h1)
        ff = jnp.dot(h1.astype(jnp.bfloat16), w2_ref[l],
                     preferred_element_type=jnp.float32) + bf2_ref[l]

        # ---- residual + LayerNorm2 ----
        x = _layernorm(x1 + ff, g2_ref[l], b2_ref[l])

    # ---- encoder final LayerNorm ----
    o_ref[0] = _layernorm(x, gf_ref[...], bf_ref[...])
    # TODO(synk): for very long T on v7x (64 MiB VMEM) tile KV with an online softmax and
    # single-buffer the resident weight blocks; not needed at these model sizes.


# ------------------------------ pallas wrapper -------------------------------

def pallas_st_encoder(av_feats, pos, hmask, stacked, final_g, final_b, nhead):
    """av_feats: (B, T, C) f32 -> (T, B, C) f32, matching the PyTorch module."""
    B, T, C = av_feats.shape
    L = stacked['wq'].shape[0]
    dh = C // nhead
    scale = 1.0 / math.sqrt(dh)
    kern = functools.partial(_st_encoder_kernel, num_layers=L, nhead=nhead, scale=scale)

    pos3 = pos.reshape(1, T, C)
    gf = final_g.reshape(1, C)
    bf = final_b.reshape(1, C)

    weights = [stacked['wq'], stacked['wk'], stacked['wv'],
               stacked['bq'], stacked['bk'], stacked['bv'],
               stacked['wo'], stacked['bo'], stacked['g1'], stacked['b1'],
               stacked['w1'], stacked['bf1'], stacked['w2'], stacked['bf2'],
               stacked['g2'], stacked['b2'], gf, bf]

    def const_spec(a):
        n = a.ndim
        return pl.BlockSpec(a.shape, lambda b, _n=n: (0,) * _n)

    out = pl.pallas_call(
        kern,
        out_shape=jax.ShapeDtypeStruct((B, T, C), jnp.float32),
        grid=(B,),
        in_specs=[pl.BlockSpec((1, T, C), lambda b: (b, 0, 0)),   # this batch's tokens
                  const_spec(pos3),
                  const_spec(hmask)] + [const_spec(w) for w in weights],
        out_specs=pl.BlockSpec((1, T, C), lambda b: (b, 0, 0)),
        compiler_params=pltpu.CompilerParams(
            dimension_semantics=("parallel",),          # shards B across the 2 TCs on v7x
            vmem_limit_bytes=32 * 1024 * 1024),
    )(av_feats, pos3, hmask, *weights)
    return jnp.transpose(out, (1, 0, 2))                # 'b t c -> t b c'


# ------------------------------ model (glue) ----------------------------------

def get_sinusoid_encoding_table(n_position, d_hid, padding_idx=None):
    position = np.arange(n_position, dtype=np.float64)[:, None]
    hid = np.arange(d_hid, dtype=np.float64)[None, :]
    angle = position / np.power(10000.0, 2.0 * (hid // 2) / d_hid)
    table = np.zeros((n_position, d_hid), dtype=np.float64)
    table[:, 0::2] = np.sin(angle[:, 0::2])
    table[:, 1::2] = np.cos(angle[:, 1::2])
    if padding_idx is not None:
        table[padding_idx] = 0.0
    return jnp.asarray(table, dtype=jnp.float32)


def make_head_mask(nhead, d_model):
    dh = d_model // nhead
    m = np.zeros((nhead, 1, d_model), np.float32)
    for h in range(nhead):
        m[h, 0, h * dh:(h + 1) * dh] = 1.0
    return jnp.asarray(m)


def init_params(key, d_model, nhead, num_layers, dim_ff):
    # torch-layout parameters (same shapes PyTorch stores)
    def nrm(k, shape, scale=0.05):
        return scale * jax.random.normal(k, shape, dtype=jnp.float32)

    layers = []
    for l in range(num_layers):
        ks = jax.random.split(jax.random.fold_in(key, l), 8)
        layers.append(dict(
            in_proj_w=nrm(ks[0], (3 * d_model, d_model)),   # torch MHA in_proj_weight
            in_proj_b=nrm(ks[1], (3 * d_model,)),
            out_proj_w=nrm(ks[2], (d_model, d_model)),
            out_proj_b=nrm(ks[3], (d_model,)),
            lin1_w=nrm(ks[4], (dim_ff, d_model)),
            lin1_b=nrm(ks[5], (dim_ff,)),
            lin2_w=nrm(ks[6], (d_model, dim_ff)),
            lin2_b=nrm(ks[7], (d_model,)),
            norm1_g=jnp.ones((d_model,), jnp.float32),
            norm1_b=jnp.zeros((d_model,), jnp.float32),
            norm2_g=jnp.ones((d_model,), jnp.float32),
            norm2_b=jnp.zeros((d_model,), jnp.float32),
        ))
    final_norm = dict(g=jnp.ones((d_model,), jnp.float32),
                      b=jnp.zeros((d_model,), jnp.float32))
    return layers, final_norm


def prep_stacked_params(torch_layers, d_model, dim_ff):
    # One-time (init-time) weight prep: pre-transpose, cast to bf16, stack over layers (L, ...).
    C = d_model

    def stack(fn, dtype=jnp.float32):
        return jnp.stack([fn(p) for p in torch_layers], axis=0).astype(dtype)

    return dict(
        wq=stack(lambda p: p['in_proj_w'][:C].T, jnp.bfloat16),          # (L, C, C)
        wk=stack(lambda p: p['in_proj_w'][C:2 * C].T, jnp.bfloat16),
        wv=stack(lambda p: p['in_proj_w'][2 * C:].T, jnp.bfloat16),
        bq=stack(lambda p: p['in_proj_b'][:C].reshape(1, C)),            # (L, 1, C)
        bk=stack(lambda p: p['in_proj_b'][C:2 * C].reshape(1, C)),
        bv=stack(lambda p: p['in_proj_b'][2 * C:].reshape(1, C)),
        wo=stack(lambda p: p['out_proj_w'].T, jnp.bfloat16),             # (L, C, C)
        bo=stack(lambda p: p['out_proj_b'].reshape(1, C)),
        g1=stack(lambda p: p['norm1_g'].reshape(1, C)),
        b1=stack(lambda p: p['norm1_b'].reshape(1, C)),
        w1=stack(lambda p: p['lin1_w'].T, jnp.bfloat16),                 # (L, C, F)
        bf1=stack(lambda p: p['lin1_b'].reshape(1, dim_ff)),
        w2=stack(lambda p: p['lin2_w'].T, jnp.bfloat16),                 # (L, F, C)
        bf2=stack(lambda p: p['lin2_b'].reshape(1, C)),
        g2=stack(lambda p: p['norm2_g'].reshape(1, C)),
        b2=stack(lambda p: p['norm2_b'].reshape(1, C)),
    )


# ----------------------------------- main --------------------------------------

if __name__ == "__main__":
    B, T = 2, 8
    d_model, nhead = 32, 4
    num_encoder_layers, dim_feedforward = 2, 64
    n_temp_feats = T                    # sinusoid table has n_temp_feats + 1 rows
    dropout = 0.0                       # inference: dropout layers are identity

    key = jax.random.PRNGKey(0)
    k_in, k_par = jax.random.split(key)
    av_feats = jax.random.normal(k_in, (B, T, d_model), dtype=jnp.float32)

    pos_table = get_sinusoid_encoding_table(n_temp_feats + 1, d_model, padding_idx=0)
    pos = pos_table[1:T + 1]                        # pos_emb(torch.arange(1, T+1))
    torch_layers, final_norm = init_params(k_par, d_model, nhead,
                                           num_encoder_layers, dim_feedforward)
    stacked = prep_stacked_params(torch_layers, d_model, dim_feedforward)
    hmask = make_head_mask(nhead, d_model)

    out = pallas_st_encoder(av_feats, pos, hmask, stacked,
                            final_norm['g'], final_norm['b'], nhead)
    out = jax.block_until_ready(out)

    assert out.shape == (T, B, d_model), out.shape
    assert bool(jnp.all(jnp.isfinite(out)))
    print("KERNEL_OK")
</pallas_src>

<mosaic_0001>
module attributes {stable_mosaic.version = 11 : i64} {
  func.func @_st_encoder_kernel(%arg0: i32, %arg1: memref<1x8x32xf32, #tpu.memory_space<vmem>>, %arg2: memref<1x8x32xf32, #tpu.memory_space<vmem>>, %arg3: memref<4x1x32xf32, #tpu.memory_space<vmem>>, %arg4: memref<2x32x32xbf16, #tpu.memory_space<vmem>>, %arg5: memref<2x32x32xbf16, #tpu.memory_space<vmem>>, %arg6: memref<2x32x32xbf16, #tpu.memory_space<vmem>>, %arg7: memref<2x1x32xf32, #tpu.memory_space<vmem>>, %arg8: memref<2x1x32xf32, #tpu.memory_space<vmem>>, %arg9: memref<2x1x32xf32, #tpu.memory_space<vmem>>, %arg10: memref<2x32x32xbf16, #tpu.memory_space<vmem>>, %arg11: memref<2x1x32xf32, #tpu.memory_space<vmem>>, %arg12: memref<2x1x32xf32, #tpu.memory_space<vmem>>, %arg13: memref<2x1x32xf32, #tpu.memory_space<vmem>>, %arg14: memref<2x32x64xbf16, #tpu.memory_space<vmem>>, %arg15: memref<2x1x64xf32, #tpu.memory_space<vmem>>, %arg16: memref<2x64x32xbf16, #tpu.memory_space<vmem>>, %arg17: memref<2x1x32xf32, #tpu.memory_space<vmem>>, %arg18: memref<2x1x32xf32, #tpu.memory_space<vmem>>, %arg19: memref<2x1x32xf32, #tpu.memory_space<vmem>>, %arg20: memref<1x32xf32, #tpu.memory_space<vmem>>, %arg21: memref<1x32xf32, #tpu.memory_space<vmem>>, %arg22: memref<1x8x32xf32, #tpu.memory_space<vmem>>) attributes {dimension_semantics = [#tpu.dimension_semantics<parallel>], iteration_bounds = array<i64: 2>, scalar_prefetch = 0 : i64, scratch_operands = 0 : i64, tpu.core_type = #tpu.core_type<tc>, window_params = [{transform_indices = @transform_0, window_bounds = array<i64: 1, 8, 32>}, {pipeline_mode = #tpu.pipeline_mode<synchronous>, transform_indices = @transform_1, window_bounds = array<i64: 1, 8, 32>}, {pipeline_mode = #tpu.pipeline_mode<synchronous>, transform_indices = @transform_2, window_bounds = array<i64: 4, 1, 32>}, {pipeline_mode = #tpu.pipeline_mode<synchronous>, transform_indices = @transform_3, window_bounds = array<i64: 2, 32, 32>}, {pipeline_mode = #tpu.pipeline_mode<synchronous>, transform_indices = @transform_4, window_bounds = array<i64: 2, 32, 32>}, {pipeline_mode = #tpu.pipeline_mode<synchronous>, transform_indices = @transform_5, window_bounds = array<i64: 2, 32, 32>}, {pipeline_mode = #tpu.pipeline_mode<synchronous>, transform_indices = @transform_6, window_bounds = array<i64: 2, 1, 32>}, {pipeline_mode = #tpu.pipeline_mode<synchronous>, transform_indices = @transform_7, window_bounds = array<i64: 2, 1, 32>}, {pipeline_mode = #tpu.pipeline_mode<synchronous>, transform_indices = @transform_8, window_bounds = array<i64: 2, 1, 32>}, {pipeline_mode = #tpu.pipeline_mode<synchronous>, transform_indices = @transform_9, window_bounds = array<i64: 2, 32, 32>}, {pipeline_mode = #tpu.pipeline_mode<synchronous>, transform_indices = @transform_10, window_bounds = array<i64: 2, 1, 32>}, {pipeline_mode = #tpu.pipeline_mode<synchronous>, transform_indices = @transform_11, window_bounds = array<i64: 2, 1, 32>}, {pipeline_mode = #tpu.pipeline_mode<synchronous>, transform_indices = @transform_12, window_bounds = array<i64: 2, 1, 32>}, {pipeline_mode = #tpu.pipeline_mode<synchronous>, transform_indices = @transform_13, window_bounds = array<i64: 2, 32, 64>}, {pipeline_mode = #tpu.pipeline_mode<synchronous>, transform_indices = @transform_14, window_bounds = array<i64: 2, 1, 64>}, {pipeline_mode = #tpu.pipeline_mode<synchronous>, transform_indices = @transform_15, window_bounds = array<i64: 2, 64, 32>}, {pipeline_mode = #tpu.pipeline_mode<synchronous>, transform_indices = @transform_16, window_bounds = array<i64: 2, 1, 32>}, {pipeline_mode = #tpu.pipeline_mode<synchronous>, transform_indices = @transform_17, window_bounds = array<i64: 2, 1, 32>}, {pipeline_mode = #tpu.pipeline_mode<synchronous>, transform_indices = @transform_18, window_bounds = array<i64: 2, 1, 32>}, {pipeline_mode = #tpu.pipeline_mode<synchronous>, transform_indices = @transform_19, window_bounds = array<i64: 1, 32>}, {pipeline_mode = #tpu.pipeline_mode<synchronous>, transform_indices = @transform_20, window_bounds = array<i64: 1, 32>}, {transform_indices = @transform_21, window_bounds = array<i64: 1, 8, 32>}]} {
    %c0 = arith.constant 0 : index
    %c0_0 = arith.constant 0 : index
    %c0_1 = arith.constant 0 : index
    %0 = vector.load %arg1[%c0, %c0_0, %c0_1] : memref<1x8x32xf32, #tpu.memory_space<vmem>>, vector<1x8x32xf32>
    %1 = vector.shape_cast %0 : vector<1x8x32xf32> to vector<8x32xf32>
    %c0_2 = arith.constant 0 : index
    %c0_3 = arith.constant 0 : index
    %c0_4 = arith.constant 0 : index
    %2 = vector.load %arg2[%c0_2, %c0_3, %c0_4] : memref<1x8x32xf32, #tpu.memory_space<vmem>>, vector<1x8x32xf32>
    %3 = vector.shape_cast %2 : vector<1x8x32xf32> to vector<8x32xf32>
    %4 = arith.addf %1, %3 : vector<8x32xf32>
    %c0_5 = arith.constant 0 : index
    %c0_6 = arith.constant 0 : index
    %c0_7 = arith.constant 0 : index
    %5 = vector.load %arg3[%c0_5, %c0_6, %c0_7] : memref<4x1x32xf32, #tpu.memory_space<vmem>>, vector<4x1x32xf32>
    %6 = arith.truncf %4 : vector<8x32xf32> to vector<8x32xbf16>
    %c0_8 = arith.constant 0 : index
    %c0_9 = arith.constant 0 : index
    %c0_10 = arith.constant 0 : index
    %7 = vector.load %arg4[%c0_8, %c0_9, %c0_10] : memref<2x32x32xbf16, #tpu.memory_space<vmem>>, vector<1x32x32xbf16>
    %8 = vector.shape_cast %7 : vector<1x32x32xbf16> to vector<32x32xbf16>
    %cst = arith.constant dense<0.000000e+00> : vector<8x32xf32>
    %9 = tpu.matmul %6, %8, %cst {dimension_numbers = #tpu.dot_dimension_numbers<[1], [0], [0], [1], [0, 0, 1, 1], [], []>} : vector<8x32xbf16>, vector<32x32xbf16>, vector<8x32xf32> -> vector<8x32xf32>
    %c0_11 = arith.constant 0 : index
    %c0_12 = arith.constant 0 : index
    %c0_13 = arith.constant 0 : index
    %10 = vector.load %arg7[%c0_11, %c0_12, %c0_13] : memref<2x1x32xf32, #tpu.memory_space<vmem>>, vector<1x1x32xf32>
    %11 = vector.shape_cast %10 : vector<1x1x32xf32> to vector<1x32xf32>
    %12 = vector.broadcast %11 : vector<1x32xf32> to vector<8x32xf32>
    %13 = arith.addf %9, %12 : vector<8x32xf32>
    %c0_14 = arith.constant 0 : index
    %c0_15 = arith.constant 0 : index
    %c0_16 = arith.constant 0 : index
    %14 = vector.load %arg5[%c0_14, %c0_15, %c0_16] : memref<2x32x32xbf16, #tpu.memory_space<vmem>>, vector<1x32x32xbf16>
    %15 = vector.shape_cast %14 : vector<1x32x32xbf16> to vector<32x32xbf16>
    %cst_17 = arith.constant dense<0.000000e+00> : vector<8x32xf32>
    %16 = tpu.matmul %6, %15, %cst_17 {dimension_numbers = #tpu.dot_dimension_numbers<[1], [0], [0], [1], [0, 0, 1, 1], [], []>} : vector<8x32xbf16>, vector<32x32xbf16>, vector<8x32xf32> -> vector<8x32xf32>
    %c0_18 = arith.constant 0 : index
    %c0_19 = arith.constant 0 : index
    %c0_20 = arith.constant 0 : index
    %17 = vector.load %arg8[%c0_18, %c0_19, %c0_20] : memref<2x1x32xf32, #tpu.memory_space<vmem>>, vector<1x1x32xf32>
    %18 = vector.shape_cast %17 : vector<1x1x32xf32> to vector<1x32xf32>
    %19 = vector.broadcast %18 : vector<1x32xf32> to vector<8x32xf32>
    %20 = arith.addf %16, %19 : vector<8x32xf32>
    %c0_21 = arith.constant 0 : index
    %c0_22 = arith.constant 0 : index
    %c0_23 = arith.constant 0 : index
    %21 = vector.load %arg6[%c0_21, %c0_22, %c0_23] : memref<2x32x32xbf16, #tpu.memory_space<vmem>>, vector<1x32x32xbf16>
    %22 = vector.shape_cast %21 : vector<1x32x32xbf16> to vector<32x32xbf16>
    %cst_24 = arith.constant dense<0.000000e+00> : vector<8x32xf32>
    %23 = tpu.matmul %6, %22, %cst_24 {dimension_numbers = #tpu.dot_dimension_numbers<[1], [0], [0], [1], [0, 0, 1, 1], [], []>} : vector<8x32xbf16>, vector<32x32xbf16>, vector<8x32xf32> -> vector<8x32xf32>
    %c0_25 = arith.constant 0 : index
    %c0_26 = arith.constant 0 : index
    %c0_27 = arith.constant 0 : index
    %24 = vector.load %arg9[%c0_25, %c0_26, %c0_27] : memref<2x1x32xf32, #tpu.memory_space<vmem>>, vector<1x1x32xf32>
    %25 = vector.shape_cast %24 : vector<1x1x32xf32> to vector<1x32xf32>
    %26 = vector.broadcast %25 : vector<1x32xf32> to vector<8x32xf32>
    %27 = arith.addf %23, %26 : vector<8x32xf32>
    %28 = vector.shape_cast %13 : vector<8x32xf32> to vector<1x8x32xf32>
    %29 = vector.broadcast %28 : vector<1x8x32xf32> to vector<4x8x32xf32>
    %30 = vector.broadcast %5 : vector<4x1x32xf32> to vector<4x8x32xf32>
    %31 = arith.mulf %29, %30 : vector<4x8x32xf32>
    %32 = vector.shape_cast %31 : vector<4x8x32xf32> to vector<32x32xf32>
    %cst_28 = arith.constant dense<0.000000e+00> : vector<32x8xf32>
    %33 = tpu.matmul %32, %20, %cst_28 {dimension_numbers = #tpu.dot_dimension_numbers<[1], [1], [0], [0], [0, 0, 1, 0], [], []>} : vector<32x32xf32>, vector<8x32xf32>, vector<32x8xf32> -> vector<32x8xf32>
    %cst_29 = arith.constant 0.353553385 : f32
    %34 = vector.broadcast %cst_29 : f32 to vector<32x8xf32>
    %35 = arith.mulf %33, %34 : vector<32x8xf32>
    %cst_30 = arith.constant dense<0xFF800000> : vector<32xf32>
    %36 = vector.multi_reduction <maximumf>, %35, %cst_30 [1] : vector<32x8xf32> to vector<32xf32>
    %37 = vector.shape_cast %36 : vector<32xf32> to vector<32x1xf32>
    %38 = vector.broadcast %37 : vector<32x1xf32> to vector<32x8xf32>
    %39 = arith.subf %35, %38 : vector<32x8xf32>
    %40 = math.exp %39 : vector<32x8xf32>
    %cst_31 = arith.constant dense<0.000000e+00> : vector<32xf32>
    %41 = vector.multi_reduction <add>, %40, %cst_31 [1] : vector<32x8xf32> to vector<32xf32>
    %42 = vector.shape_cast %41 : vector<32xf32> to vector<32x1xf32>
    %43 = vector.broadcast %42 : vector<32x1xf32> to vector<32x8xf32>
    %44 = arith.divf %40, %43 : vector<32x8xf32>
    %cst_32 = arith.constant dense<0.000000e+00> : vector<32x32xf32>
    %45 = tpu.matmul %44, %27, %cst_32 {dimension_numbers = #tpu.dot_dimension_numbers<[1], [0], [0], [1], [0, 0, 1, 1], [], []>} : vector<32x8xf32>, vector<8x32xf32>, vector<32x32xf32> -> vector<32x32xf32>
    %46 = vector.shape_cast %45 : vector<32x32xf32> to vector<4x8x32xf32>
    %47 = vector.broadcast %5 : vector<4x1x32xf32> to vector<4x8x32xf32>
    %48 = arith.mulf %46, %47 : vector<4x8x32xf32>
    %cst_33 = arith.constant dense<0.000000e+00> : vector<8x32xf32>
    %49 = vector.multi_reduction <add>, %48, %cst_33 [0] : vector<4x8x32xf32> to vector<8x32xf32>
    %50 = arith.truncf %49 : vector<8x32xf32> to vector<8x32xbf16>
    %c0_34 = arith.constant 0 : index
    %c0_35 = arith.constant 0 : index
    %c0_36 = arith.constant 0 : index
    %51 = vector.load %arg10[%c0_34, %c0_35, %c0_36] : memref<2x32x32xbf16, #tpu.memory_space<vmem>>, vector<1x32x32xbf16>
    %52 = vector.shape_cast %51 : vector<1x32x32xbf16> to vector<32x32xbf16>
    %cst_37 = arith.constant dense<0.000000e+00> : vector<8x32xf32>
    %53 = tpu.matmul %50, %52, %cst_37 {dimension_numbers = #tpu.dot_dimension_numbers<[1], [0], [0], [1], [0, 0, 1, 1], [], []>} : vector<8x32xbf16>, vector<32x32xbf16>, vector<8x32xf32> -> vector<8x32xf32>
    %c0_38 = arith.constant 0 : index
    %c0_39 = arith.constant 0 : index
    %c0_40 = arith.constant 0 : index
    %54 = vector.load %arg11[%c0_38, %c0_39, %c0_40] : memref<2x1x32xf32, #tpu.memory_space<vmem>>, vector<1x1x32xf32>
    %55 = vector.shape_cast %54 : vector<1x1x32xf32> to vector<1x32xf32>
    %56 = vector.broadcast %55 : vector<1x32xf32> to vector<8x32xf32>
    %57 = arith.addf %53, %56 : vector<8x32xf32>
    %58 = arith.addf %4, %57 : vector<8x32xf32>
    %c0_41 = arith.constant 0 : index
    %c0_42 = arith.constant 0 : index
    %c0_43 = arith.constant 0 : index
    %59 = vector.load %arg12[%c0_41, %c0_42, %c0_43] : memref<2x1x32xf32, #tpu.memory_space<vmem>>, vector<1x1x32xf32>
    %60 = vector.shape_cast %59 : vector<1x1x32xf32> to vector<1x32xf32>
    %c0_44 = arith.constant 0 : index
    %c0_45 = arith.constant 0 : index
    %c0_46 = arith.constant 0 : index
    %61 = vector.load %arg13[%c0_44, %c0_45, %c0_46] : memref<2x1x32xf32, #tpu.memory_space<vmem>>, vector<1x1x32xf32>
    %62 = vector.shape_cast %61 : vector<1x1x32xf32> to vector<1x32xf32>
    %cst_47 = arith.constant dense<0.000000e+00> : vector<8xf32>
    %63 = vector.multi_reduction <add>, %58, %cst_47 [1] : vector<8x32xf32> to vector<8xf32>
    %64 = vector.shape_cast %63 : vector<8xf32> to vector<8x1xf32>
    %cst_48 = arith.constant 3.200000e+01 : f32
    %65 = vector.broadcast %cst_48 : f32 to vector<8x1xf32>
    %66 = arith.divf %64, %65 : vector<8x1xf32>
    %67 = vector.broadcast %66 : vector<8x1xf32> to vector<8x32xf32>
    %68 = arith.subf %58, %67 : vector<8x32xf32>
    %69 = arith.mulf %68, %68 : vector<8x32xf32>
    %cst_49 = arith.constant dense<0.000000e+00> : vector<8xf32>
    %70 = vector.multi_reduction <add>, %69, %cst_49 [1] : vector<8x32xf32> to vector<8xf32>
    %71 = vector.shape_cast %70 : vector<8xf32> to vector<8x1xf32>
    %cst_50 = arith.constant 3.200000e+01 : f32
    %72 = vector.broadcast %cst_50 : f32 to vector<8x1xf32>
    %73 = arith.divf %71, %72 : vector<8x1xf32>
    %74 = vector.broadcast %66 : vector<8x1xf32> to vector<8x32xf32>
    %75 = arith.subf %58, %74 : vector<8x32xf32>
    %cst_51 = arith.constant 9.99999974E-6 : f32
    %76 = vector.broadcast %cst_51 : f32 to vector<8x1xf32>
    %77 = arith.addf %73, %76 : vector<8x1xf32>
    %78 = math.rsqrt %77 : vector<8x1xf32>
    %79 = vector.broadcast %78 : vector<8x1xf32> to vector<8x32xf32>
    %80 = arith.mulf %75, %79 : vector<8x32xf32>
    %81 = vector.broadcast %60 : vector<1x32xf32> to vector<8x32xf32>
    %82 = arith.mulf %80, %81 : vector<8x32xf32>
    %83 = vector.broadcast %62 : vector<1x32xf32> to vector<8x32xf32>
    %84 = arith.addf %82, %83 : vector<8x32xf32>
    %85 = arith.truncf %84 : vector<8x32xf32> to vector<8x32xbf16>
    %c0_52 = arith.constant 0 : index
    %c0_53 = arith.constant 0 : index
    %c0_54 = arith.constant 0 : index
    %86 = vector.load %arg14[%c0_52, %c0_53, %c0_54] : memref<2x32x64xbf16, #tpu.memory_space<vmem>>, vector<1x32x64xbf16>
    %87 = vector.shape_cast %86 : vector<1x32x64xbf16> to vector<32x64xbf16>
    %cst_55 = arith.constant dense<0.000000e+00> : vector<8x64xf32>
    %88 = tpu.matmul %85, %87, %cst_55 {dimension_numbers = #tpu.dot_dimension_numbers<[1], [0], [0], [1], [0, 0, 1, 1], [], []>} : vector<8x32xbf16>, vector<32x64xbf16>, vector<8x64xf32> -> vector<8x64xf32>
    %c0_56 = arith.constant 0 : index
    %c0_57 = arith.constant 0 : index
    %c0_58 = arith.constant 0 : index
    %89 = vector.load %arg15[%c0_56, %c0_57, %c0_58] : memref<2x1x64xf32, #tpu.memory_space<vmem>>, vector<1x1x64xf32>
    %90 = vector.shape_cast %89 : vector<1x1x64xf32> to vector<1x64xf32>
    %91 = vector.broadcast %90 : vector<1x64xf32> to vector<8x64xf32>
    %92 = arith.addf %88, %91 : vector<8x64xf32>
    %cst_59 = arith.constant 5.000000e-01 : f32
    %93 = vector.broadcast %cst_59 : f32 to vector<8x64xf32>
    %94 = arith.mulf %93, %92 : vector<8x64xf32>
    %cst_60 = arith.constant 0.707106769 : f32
    %95 = vector.broadcast %cst_60 : f32 to vector<8x64xf32>
    %96 = arith.mulf %92, %95 : vector<8x64xf32>
    %97 = math.absf %96 : vector<8x64xf32>
    %cst_61 = arith.constant 5.000000e-01 : f32
    %98 = vector.broadcast %cst_61 : f32 to vector<8x64xf32>
    %99 = arith.mulf %98, %97 : vector<8x64xf32>
    %cst_62 = arith.constant 1.000000e+00 : f32
    %100 = vector.broadcast %cst_62 : f32 to vector<8x64xf32>
    %101 = arith.addf %100, %99 : vector<8x64xf32>
    %cst_63 = arith.constant 1.000000e+00 : f32
    %102 = vector.broadcast %cst_63 : f32 to vector<8x64xf32>
    %103 = arith.divf %102, %101 : vector<8x64xf32>
    %cst_64 = arith.constant 0.170872763 : f32
    %104 = vector.broadcast %cst_64 : f32 to vector<8x64xf32>
    %105 = arith.mulf %103, %104 : vector<8x64xf32>
    %cst_65 = arith.constant -0.822152256 : f32
    %106 = vector.broadcast %cst_65 : f32 to vector<8x64xf32>
    %107 = arith.addf %106, %105 : vector<8x64xf32>
    %108 = arith.mulf %103, %107 : vector<8x64xf32>
    %cst_66 = arith.constant 1.48851585 : f32
    %109 = vector.broadcast %cst_66 : f32 to vector<8x64xf32>
    %110 = arith.addf %109, %108 : vector<8x64xf32>
    %111 = arith.mulf %103, %110 : vector<8x64xf32>
    %cst_67 = arith.constant -1.13520396 : f32
    %112 = vector.broadcast %cst_67 : f32 to vector<8x64xf32>
    %113 = arith.addf %112, %111 : vector<8x64xf32>
    %114 = arith.mulf %103, %113 : vector<8x64xf32>
    %cst_68 = arith.constant 0.278868079 : f32
    %115 = vector.broadcast %cst_68 : f32 to vector<8x64xf32>
    %116 = arith.addf %115, %114 : vector<8x64xf32>
    %117 = arith.mulf %103, %116 : vector<8x64xf32>
    %cst_69 = arith.constant -0.186288059 : f32
    %118 = vector.broadcast %cst_69 : f32 to vector<8x64xf32>
    %119 = arith.addf %118, %117 : vector<8x64xf32>
    %120 = arith.mulf %103, %119 : vector<8x64xf32>
    %cst_70 = arith.constant 0.0967841818 : f32
    %121 = vector.broadcast %cst_70 : f32 to vector<8x64xf32>
    %122 = arith.addf %121, %120 : vector<8x64xf32>
    %123 = arith.mulf %103, %122 : vector<8x64xf32>
    %cst_71 = arith.constant 0.374091953 : f32
    %124 = vector.broadcast %cst_71 : f32 to vector<8x64xf32>
    %125 = arith.addf %124, %123 : vector<8x64xf32>
    %126 = arith.mulf %103, %125 : vector<8x64xf32>
    %cst_72 = arith.constant 1.00002372 : f32
    %127 = vector.broadcast %cst_72 : f32 to vector<8x64xf32>
    %128 = arith.addf %127, %126 : vector<8x64xf32>
    %129 = arith.mulf %103, %128 : vector<8x64xf32>
    %cst_73 = arith.constant -1.26551223 : f32
    %130 = vector.broadcast %cst_73 : f32 to vector<8x64xf32>
    %131 = arith.addf %130, %129 : vector<8x64xf32>
    %cst_74 = arith.constant 0.000000e+00 : f32
    %132 = vector.broadcast %cst_74 : f32 to vector<8x64xf32>
    %133 = arith.subf %132, %97 : vector<8x64xf32>
    %134 = arith.mulf %133, %97 : vector<8x64xf32>
    %135 = arith.addf %134, %131 : vector<8x64xf32>
    %136 = math.exp %135 : vector<8x64xf32>
    %137 = arith.mulf %103, %136 : vector<8x64xf32>
    %cst_75 = arith.constant 0.000000e+00 : f32
    %138 = vector.broadcast %cst_75 : f32 to vector<8x64xf32>
    %139 = arith.cmpf oge, %96, %138 : vector<8x64xf32>
    %cst_76 = arith.constant 2.000000e+00 : f32
    %140 = vector.broadcast %cst_76 : f32 to vector<8x64xf32>
    %141 = arith.subf %140, %137 : vector<8x64xf32>
    %142 = arith.select %139, %137, %141 : vector<8x64xi1>, vector<8x64xf32>
    %cst_77 = arith.constant 1.000000e+00 : f32
    %143 = vector.broadcast %cst_77 : f32 to vector<8x64xf32>
    %144 = arith.subf %143, %142 : vector<8x64xf32>
    %cst_78 = arith.constant 1.000000e+00 : f32
    %145 = vector.broadcast %cst_78 : f32 to vector<8x64xf32>
    %146 = arith.addf %145, %144 : vector<8x64xf32>
    %147 = arith.mulf %94, %146 : vector<8x64xf32>
    %148 = arith.truncf %147 : vector<8x64xf32> to vector<8x64xbf16>
    %c0_79 = arith.constant 0 : index
    %c0_80 = arith.constant 0 : index
    %c0_81 = arith.constant 0 : index
    %149 = vector.load %arg16[%c0_79, %c0_80, %c0_81] : memref<2x64x32xbf16, #tpu.memory_space<vmem>>, vector<1x64x32xbf16>
    %150 = vector.shape_cast %149 : vector<1x64x32xbf16> to vector<64x32xbf16>
    %cst_82 = arith.constant dense<0.000000e+00> : vector<8x32xf32>
    %151 = tpu.matmul %148, %150, %cst_82 {dimension_numbers = #tpu.dot_dimension_numbers<[1], [0], [0], [1], [0, 0, 1, 1], [], []>} : vector<8x64xbf16>, vector<64x32xbf16>, vector<8x32xf32> -> vector<8x32xf32>
    %c0_83 = arith.constant 0 : index
    %c0_84 = arith.constant 0 : index
    %c0_85 = arith.constant 0 : index
    %152 = vector.load %arg17[%c0_83, %c0_84, %c0_85] : memref<2x1x32xf32, #tpu.memory_space<vmem>>, vector<1x1x32xf32>
    %153 = vector.shape_cast %152 : vector<1x1x32xf32> to vector<1x32xf32>
    %154 = vector.broadcast %153 : vector<1x32xf32> to vector<8x32xf32>
    %155 = arith.addf %151, %154 : vector<8x32xf32>
    %156 = arith.addf %84, %155 : vector<8x32xf32>
    %c0_86 = arith.constant 0 : index
    %c0_87 = arith.constant 0 : index
    %c0_88 = arith.constant 0 : index
    %157 = vector.load %arg18[%c0_86, %c0_87, %c0_88] : memref<2x1x32xf32, #tpu.memory_space<vmem>>, vector<1x1x32xf32>
    %158 = vector.shape_cast %157 : vector<1x1x32xf32> to vector<1x32xf32>
    %c0_89 = arith.constant 0 : index
    %c0_90 = arith.constant 0 : index
    %c0_91 = arith.constant 0 : index
    %159 = vector.load %arg19[%c0_89, %c0_90, %c0_91] : memref<2x1x32xf32, #tpu.memory_space<vmem>>, vector<1x1x32xf32>
    %160 = vector.shape_cast %159 : vector<1x1x32xf32> to vector<1x32xf32>
    %cst_92 = arith.constant dense<0.000000e+00> : vector<8xf32>
    %161 = vector.multi_reduction <add>, %156, %cst_92 [1] : vector<8x32xf32> to vector<8xf32>
    %162 = vector.shape_cast %161 : vector<8xf32> to vector<8x1xf32>
    %cst_93 = arith.constant 3.200000e+01 : f32
    %163 = vector.broadcast %cst_93 : f32 to vector<8x1xf32>
    %164 = arith.divf %162, %163 : vector<8x1xf32>
    %165 = vector.broadcast %164 : vector<8x1xf32> to vector<8x32xf32>
    %166 = arith.subf %156, %165 : vector<8x32xf32>
    %167 = arith.mulf %166, %166 : vector<8x32xf32>
    %cst_94 = arith.constant dense<0.000000e+00> : vector<8xf32>
    %168 = vector.multi_reduction <add>, %167, %cst_94 [1] : vector<8x32xf32> to vector<8xf32>
    %169 = vector.shape_cast %168 : vector<8xf32> to vector<8x1xf32>
    %cst_95 = arith.constant 3.200000e+01 : f32
    %170 = vector.broadcast %cst_95 : f32 to vector<8x1xf32>
    %171 = arith.divf %169, %170 : vector<8x1xf32>
    %172 = vector.broadcast %164 : vector<8x1xf32> to vector<8x32xf32>
    %173 = arith.subf %156, %172 : vector<8x32xf32>
    %cst_96 = arith.constant 9.99999974E-6 : f32
    %174 = vector.broadcast %cst_96 : f32 to vector<8x1xf32>
    %175 = arith.addf %171, %174 : vector<8x1xf32>
    %176 = math.rsqrt %175 : vector<8x1xf32>
    %177 = vector.broadcast %176 : vector<8x1xf32> to vector<8x32xf32>
    %178 = arith.mulf %173, %177 : vector<8x32xf32>
    %179 = vector.broadcast %158 : vector<1x32xf32> to vector<8x32xf32>
    %180 = arith.mulf %178, %179 : vector<8x32xf32>
    %181 = vector.broadcast %160 : vector<1x32xf32> to vector<8x32xf32>
    %182 = arith.addf %180, %181 : vector<8x32xf32>
    %183 = arith.truncf %182 : vector<8x32xf32> to vector<8x32xbf16>
    %c1 = arith.constant 1 : index
    %c0_97 = arith.constant 0 : index
    %c0_98 = arith.constant 0 : index
    %184 = vector.load %arg4[%c1, %c0_97, %c0_98] : memref<2x32x32xbf16, #tpu.memory_space<vmem>>, vector<1x32x32xbf16>
    %185 = vector.shape_cast %184 : vector<1x32x32xbf16> to vector<32x32xbf16>
    %cst_99 = arith.constant dense<0.000000e+00> : vector<8x32xf32>
    %186 = tpu.matmul %183, %185, %cst_99 {dimension_numbers = #tpu.dot_dimension_numbers<[1], [0], [0], [1], [0, 0, 1, 1], [], []>} : vector<8x32xbf16>, vector<32x32xbf16>, vector<8x32xf32> -> vector<8x32xf32>
    %c1_100 = arith.constant 1 : index
    %c0_101 = arith.constant 0 : index
    %c0_102 = arith.constant 0 : index
    %187 = vector.load %arg7[%c1_100, %c0_101, %c0_102] : memref<2x1x32xf32, #tpu.memory_space<vmem>>, vector<1x1x32xf32>
    %188 = vector.shape_cast %187 : vector<1x1x32xf32> to vector<1x32xf32>
    %189 = vector.broadcast %188 : vector<1x32xf32> to vector<8x32xf32>
    %190 = arith.addf %186, %189 : vector<8x32xf32>
    %c1_103 = arith.constant 1 : index
    %c0_104 = arith.constant 0 : index
    %c0_105 = arith.constant 0 : index
    %191 = vector.load %arg5[%c1_103, %c0_104, %c0_105] : memref<2x32x32xbf16, #tpu.memory_space<vmem>>, vector<1x32x32xbf16>
    %192 = vector.shape_cast %191 : vector<1x32x32xbf16> to vector<32x32xbf16>
    %cst_106 = arith.constant dense<0.000000e+00> : vector<8x32xf32>
    %193 = tpu.matmul %183, %192, %cst_106 {dimension_numbers = #tpu.dot_dimension_numbers<[1], [0], [0], [1], [0, 0, 1, 1], [], []>} : vector<8x32xbf16>, vector<32x32xbf16>, vector<8x32xf32> -> vector<8x32xf32>
    %c1_107 = arith.constant 1 : index
    %c0_108 = arith.constant 0 : index
    %c0_109 = arith.constant 0 : index
    %194 = vector.load %arg8[%c1_107, %c0_108, %c0_109] : memref<2x1x32xf32, #tpu.memory_space<vmem>>, vector<1x1x32xf32>
    %195 = vector.shape_cast %194 : vector<1x1x32xf32> to vector<1x32xf32>
    %196 = vector.broadcast %195 : vector<1x32xf32> to vector<8x32xf32>
    %197 = arith.addf %193, %196 : vector<8x32xf32>
    %c1_110 = arith.constant 1 : index
    %c0_111 = arith.constant 0 : index
    %c0_112 = arith.constant 0 : index
    %198 = vector.load %arg6[%c1_110, %c0_111, %c0_112] : memref<2x32x32xbf16, #tpu.memory_space<vmem>>, vector<1x32x32xbf16>
    %199 = vector.shape_cast %198 : vector<1x32x32xbf16> to vector<32x32xbf16>
    %cst_113 = arith.constant dense<0.000000e+00> : vector<8x32xf32>
    %200 = tpu.matmul %183, %199, %cst_113 {dimension_numbers = #tpu.dot_dimension_numbers<[1], [0], [0], [1], [0, 0, 1, 1], [], []>} : vector<8x32xbf16>, vector<32x32xbf16>, vector<8x32xf32> -> vector<8x32xf32>
    %c1_114 = arith.constant 1 : index
    %c0_115 = arith.constant 0 : index
    %c0_116 = arith.constant 0 : index
    %201 = vector.load %arg9[%c1_114, %c0_115, %c0_116] : memref<2x1x32xf32, #tpu.memory_space<vmem>>, vector<1x1x32xf32>
    %202 = vector.shape_cast %201 : vector<1x1x32xf32> to vector<1x32xf32>
    %203 = vector.broadcast %202 : vector<1x32xf32> to vector<8x32xf32>
    %204 = arith.addf %200, %203 : vector<8x32xf32>
    %205 = vector.shape_cast %190 : vector<8x32xf32> to vector<1x8x32xf32>
    %206 = vector.broadcast %205 : vector<1x8x32xf32> to vector<4x8x32xf32>
    %207 = vector.broadcast %5 : vector<4x1x32xf32> to vector<4x8x32xf32>
    %208 = arith.mulf %206, %207 : vector<4x8x32xf32>
    %209 = vector.shape_cast %208 : vector<4x8x32xf32> to vector<32x32xf32>
    %cst_117 = arith.constant dense<0.000000e+00> : vector<32x8xf32>
    %210 = tpu.matmul %209, %197, %cst_117 {dimension_numbers = #tpu.dot_dimension_numbers<[1], [1], [0], [0], [0, 0, 1, 0], [], []>} : vector<32x32xf32>, vector<8x32xf32>, vector<32x8xf32> -> vector<32x8xf32>
    %cst_118 = arith.constant 0.353553385 : f32
    %211 = vector.broadcast %cst_118 : f32 to vector<32x8xf32>
    %212 = arith.mulf %210, %211 : vector<32x8xf32>
    %cst_119 = arith.constant dense<0xFF800000> : vector<32xf32>
    %213 = vector.multi_reduction <maximumf>, %212, %cst_119 [1] : vector<32x8xf32> to vector<32xf32>
    %214 = vector.shape_cast %213 : vector<32xf32> to vector<32x1xf32>
    %215 = vector.broadcast %214 : vector<32x1xf32> to vector<32x8xf32>
    %216 = arith.subf %212, %215 : vector<32x8xf32>
    %217 = math.exp %216 : vector<32x8xf32>
    %cst_120 = arith.constant dense<0.000000e+00> : vector<32xf32>
    %218 = vector.multi_reduction <add>, %217, %cst_120 [1] : vector<32x8xf32> to vector<32xf32>
    %219 = vector.shape_cast %218 : vector<32xf32> to vector<32x1xf32>
    %220 = vector.broadcast %219 : vector<32x1xf32> to vector<32x8xf32>
    %221 = arith.divf %217, %220 : vector<32x8xf32>
    %cst_121 = arith.constant dense<0.000000e+00> : vector<32x32xf32>
    %222 = tpu.matmul %221, %204, %cst_121 {dimension_numbers = #tpu.dot_dimension_numbers<[1], [0], [0], [1], [0, 0, 1, 1], [], []>} : vector<32x8xf32>, vector<8x32xf32>, vector<32x32xf32> -> vector<32x32xf32>
    %223 = vector.shape_cast %222 : vector<32x32xf32> to vector<4x8x32xf32>
    %224 = vector.broadcast %5 : vector<4x1x32xf32> to vector<4x8x32xf32>
    %225 = arith.mulf %223, %224 : vector<4x8x32xf32>
    %cst_122 = arith.constant dense<0.000000e+00> : vector<8x32xf32>
    %226 = vector.multi_reduction <add>, %225, %cst_122 [0] : vector<4x8x32xf32> to vector<8x32xf32>
    %227 = arith.truncf %226 : vector<8x32xf32> to vector<8x32xbf16>
    %c1_123 = arith.constant 1 : index
    %c0_124 = arith.constant 0 : index
    %c0_125 = arith.constant 0 : index
    %228 = vector.load %arg10[%c1_123, %c0_124, %c0_125] : memref<2x32x32xbf16, #tpu.memory_space<vmem>>, vector<1x32x32xbf16>
    %229 = vector.shape_cast %228 : vector<1x32x32xbf16> to vector<32x32xbf16>
    %cst_126 = arith.constant dense<0.000000e+00> : vector<8x32xf32>
    %230 = tpu.matmul %227, %229, %cst_126 {dimension_numbers = #tpu.dot_dimension_numbers<[1], [0], [0], [1], [0, 0, 1, 1], [], []>} : vector<8x32xbf16>, vector<32x32xbf16>, vector<8x32xf32> -> vector<8x32xf32>
    %c1_127 = arith.constant 1 : index
    %c0_128 = arith.constant 0 : index
    %c0_129 = arith.constant 0 : index
    %231 = vector.load %arg11[%c1_127, %c0_128, %c0_129] : memref<2x1x32xf32, #tpu.memory_space<vmem>>, vector<1x1x32xf32>
    %232 = vector.shape_cast %231 : vector<1x1x32xf32> to vector<1x32xf32>
    %233 = vector.broadcast %232 : vector<1x32xf32> to vector<8x32xf32>
    %234 = arith.addf %230, %233 : vector<8x32xf32>
    %235 = arith.addf %182, %234 : vector<8x32xf32>
    %c1_130 = arith.constant 1 : index
    %c0_131 = arith.constant 0 : index
    %c0_132 = arith.constant 0 : index
    %236 = vector.load %arg12[%c1_130, %c0_131, %c0_132] : memref<2x1x32xf32, #tpu.memory_space<vmem>>, vector<1x1x32xf32>
    %237 = vector.shape_cast %236 : vector<1x1x32xf32> to vector<1x32xf32>
    %c1_133 = arith.constant 1 : index
    %c0_134 = arith.constant 0 : index
    %c0_135 = arith.constant 0 : index
    %238 = vector.load %arg13[%c1_133, %c0_134, %c0_135] : memref<2x1x32xf32, #tpu.memory_space<vmem>>, vector<1x1x32xf32>
    %239 = vector.shape_cast %238 : vector<1x1x32xf32> to vector<1x32xf32>
    %cst_136 = arith.constant dense<0.000000e+00> : vector<8xf32>
    %240 = vector.multi_reduction <add>, %235, %cst_136 [1] : vector<8x32xf32> to vector<8xf32>
    %241 = vector.shape_cast %240 : vector<8xf32> to vector<8x1xf32>
    %cst_137 = arith.constant 3.200000e+01 : f32
    %242 = vector.broadcast %cst_137 : f32 to vector<8x1xf32>
    %243 = arith.divf %241, %242 : vector<8x1xf32>
    %244 = vector.broadcast %243 : vector<8x1xf32> to vector<8x32xf32>
    %245 = arith.subf %235, %244 : vector<8x32xf32>
    %246 = arith.mulf %245, %245 : vector<8x32xf32>
    %cst_138 = arith.constant dense<0.000000e+00> : vector<8xf32>
    %247 = vector.multi_reduction <add>, %246, %cst_138 [1] : vector<8x32xf32> to vector<8xf32>
    %248 = vector.shape_cast %247 : vector<8xf32> to vector<8x1xf32>
    %cst_139 = arith.constant 3.200000e+01 : f32
    %249 = vector.broadcast %cst_139 : f32 to vector<8x1xf32>
    %250 = arith.divf %248, %249 : vector<8x1xf32>
    %251 = vector.broadcast %243 : vector<8x1xf32> to vector<8x32xf32>
    %252 = arith.subf %235, %251 : vector<8x32xf32>
    %cst_140 = arith.constant 9.99999974E-6 : f32
    %253 = vector.broadcast %cst_140 : f32 to vector<8x1xf32>
    %254 = arith.addf %250, %253 : vector<8x1xf32>
    %255 = math.rsqrt %254 : vector<8x1xf32>
    %256 = vector.broadcast %255 : vector<8x1xf32> to vector<8x32xf32>
    %257 = arith.mulf %252, %256 : vector<8x32xf32>
    %258 = vector.broadcast %237 : vector<1x32xf32> to vector<8x32xf32>
    %259 = arith.mulf %257, %258 : vector<8x32xf32>
    %260 = vector.broadcast %239 : vector<1x32xf32> to vector<8x32xf32>
    %261 = arith.addf %259, %260 : vector<8x32xf32>
    %262 = arith.truncf %261 : vector<8x32xf32> to vector<8x32xbf16>
    %c1_141 = arith.constant 1 : index
    %c0_142 = arith.constant 0 : index
    %c0_143 = arith.constant 0 : index
    %263 = vector.load %arg14[%c1_141, %c0_142, %c0_143] : memref<2x32x64xbf16, #tpu.memory_space<vmem>>, vector<1x32x64xbf16>
    %264 = vector.shape_cast %263 : vector<1x32x64xbf16> to vector<32x64xbf16>
    %cst_144 = arith.constant dense<0.000000e+00> : vector<8x64xf32>
    %265 = tpu.matmul %262, %264, %cst_144 {dimension_numbers = #tpu.dot_dimension_numbers<[1], [0], [0], [1], [0, 0, 1, 1], [], []>} : vector<8x32xbf16>, vector<32x64xbf16>, vector<8x64xf32> -> vector<8x64xf32>
    %c1_145 = arith.constant 1 : index
    %c0_146 = arith.constant 0 : index
    %c0_147 = arith.constant 0 : index
    %266 = vector.load %arg15[%c1_145, %c0_146, %c0_147] : memref<2x1x64xf32, #tpu.memory_space<vmem>>, vector<1x1x64xf32>
    %267 = vector.shape_cast %266 : vector<1x1x64xf32> to vector<1x64xf32>
    %268 = vector.broadcast %267 : vector<1x64xf32> to vector<8x64xf32>
    %269 = arith.addf %265, %268 : vector<8x64xf32>
    %cst_148 = arith.constant 5.000000e-01 : f32
    %270 = vector.broadcast %cst_148 : f32 to vector<8x64xf32>
    %271 = arith.mulf %270, %269 : vector<8x64xf32>
    %cst_149 = arith.constant 0.707106769 : f32
    %272 = vector.broadcast %cst_149 : f32 to vector<8x64xf32>
    %273 = arith.mulf %269, %272 : vector<8x64xf32>
    %274 = math.absf %273 : vector<8x64xf32>
    %cst_150 = arith.constant 5.000000e-01 : f32
    %275 = vector.broadcast %cst_150 : f32 to vector<8x64xf32>
    %276 = arith.mulf %275, %274 : vector<8x64xf32>
    %cst_151 = arith.constant 1.000000e+00 : f32
    %277 = vector.broadcast %cst_151 : f32 to vector<8x64xf32>
    %278 = arith.addf %277, %276 : vector<8x64xf32>
    %cst_152 = arith.constant 1.000000e+00 : f32
    %279 = vector.broadcast %cst_152 : f32 to vector<8x64xf32>
    %280 = arith.divf %279, %278 : vector<8x64xf32>
    %cst_153 = arith.constant 0.170872763 : f32
    %281 = vector.broadcast %cst_153 : f32 to vector<8x64xf32>
    %282 = arith.mulf %280, %281 : vector<8x64xf32>
    %cst_154 = arith.constant -0.822152256 : f32
    %283 = vector.broadcast %cst_154 : f32 to vector<8x64xf32>
    %284 = arith.addf %283, %282 : vector<8x64xf32>
    %285 = arith.mulf %280, %284 : vector<8x64xf32>
    %cst_155 = arith.constant 1.48851585 : f32
    %286 = vector.broadcast %cst_155 : f32 to vector<8x64xf32>
    %287 = arith.addf %286, %285 : vector<8x64xf32>
    %288 = arith.mulf %280, %287 : vector<8x64xf32>
    %cst_156 = arith.constant -1.13520396 : f32
    %289 = vector.broadcast %cst_156 : f32 to vector<8x64xf32>
    %290 = arith.addf %289, %288 : vector<8x64xf32>
    %291 = arith.mulf %280, %290 : vector<8x64xf32>
    %cst_157 = arith.constant 0.278868079 : f32
    %292 = vector.broadcast %cst_157 : f32 to vector<8x64xf32>
    %293 = arith.addf %292, %291 : vector<8x64xf32>
    %294 = arith.mulf %280, %293 : vector<8x64xf32>
    %cst_158 = arith.constant -0.186288059 : f32
    %295 = vector.broadcast %cst_158 : f32 to vector<8x64xf32>
    %296 = arith.addf %295, %294 : vector<8x64xf32>
    %297 = arith.mulf %280, %296 : vector<8x64xf32>
    %cst_159 = arith.constant 0.0967841818 : f32
    %298 = vector.broadcast %cst_159 : f32 to vector<8x64xf32>
    %299 = arith.addf %298, %297 : vector<8x64xf32>
    %300 = arith.mulf %280, %299 : vector<8x64xf32>
    %cst_160 = arith.constant 0.374091953 : f32
    %301 = vector.broadcast %cst_160 : f32 to vector<8x64xf32>
    %302 = arith.addf %301, %300 : vector<8x64xf32>
    %303 = arith.mulf %280, %302 : vector<8x64xf32>
    %cst_161 = arith.constant 1.00002372 : f32
    %304 = vector.broadcast %cst_161 : f32 to vector<8x64xf32>
    %305 = arith.addf %304, %303 : vector<8x64xf32>
    %306 = arith.mulf %280, %305 : vector<8x64xf32>
    %cst_162 = arith.constant -1.26551223 : f32
    %307 = vector.broadcast %cst_162 : f32 to vector<8x64xf32>
    %308 = arith.addf %307, %306 : vector<8x64xf32>
    %cst_163 = arith.constant 0.000000e+00 : f32
    %309 = vector.broadcast %cst_163 : f32 to vector<8x64xf32>
    %310 = arith.subf %309, %274 : vector<8x64xf32>
    %311 = arith.mulf %310, %274 : vector<8x64xf32>
    %312 = arith.addf %311, %308 : vector<8x64xf32>
    %313 = math.exp %312 : vector<8x64xf32>
    %314 = arith.mulf %280, %313 : vector<8x64xf32>
    %cst_164 = arith.constant 0.000000e+00 : f32
    %315 = vector.broadcast %cst_164 : f32 to vector<8x64xf32>
    %316 = arith.cmpf oge, %273, %315 : vector<8x64xf32>
    %cst_165 = arith.constant 2.000000e+00 : f32
    %317 = vector.broadcast %cst_165 : f32 to vector<8x64xf32>
    %318 = arith.subf %317, %314 : vector<8x64xf32>
    %319 = arith.select %316, %314, %318 : vector<8x64xi1>, vector<8x64xf32>
    %cst_166 = arith.constant 1.000000e+00 : f32
    %320 = vector.broadcast %cst_166 : f32 to vector<8x64xf32>
    %321 = arith.subf %320, %319 : vector<8x64xf32>
    %cst_167 = arith.constant 1.000000e+00 : f32
    %322 = vector.broadcast %cst_167 : f32 to vector<8x64xf32>
    %323 = arith.addf %322, %321 : vector<8x64xf32>
    %324 = arith.mulf %271, %323 : vector<8x64xf32>
    %325 = arith.truncf %324 : vector<8x64xf32> to vector<8x64xbf16>
    %c1_168 = arith.constant 1 : index
    %c0_169 = arith.constant 0 : index
    %c0_170 = arith.constant 0 : index
    %326 = vector.load %arg16[%c1_168, %c0_169, %c0_170] : memref<2x64x32xbf16, #tpu.memory_space<vmem>>, vector<1x64x32xbf16>
    %327 = vector.shape_cast %326 : vector<1x64x32xbf16> to vector<64x32xbf16>
    %cst_171 = arith.constant dense<0.000000e+00> : vector<8x32xf32>
    %328 = tpu.matmul %325, %327, %cst_171 {dimension_numbers = #tpu.dot_dimension_numbers<[1], [0], [0], [1], [0, 0, 1, 1], [], []>} : vector<8x64xbf16>, vector<64x32xbf16>, vector<8x32xf32> -> vector<8x32xf32>
    %c1_172 = arith.constant 1 : index
    %c0_173 = arith.constant 0 : index
    %c0_174 = arith.constant 0 : index
    %329 = vector.load %arg17[%c1_172, %c0_173, %c0_174] : memref<2x1x32xf32, #tpu.memory_space<vmem>>, vector<1x1x32xf32>
    %330 = vector.shape_cast %329 : vector<1x1x32xf32> to vector<1x32xf32>
    %331 = vector.broadcast %330 : vector<1x32xf32> to vector<8x32xf32>
    %332 = arith.addf %328, %331 : vector<8x32xf32>
    %333 = arith.addf %261, %332 : vector<8x32xf32>
    %c1_175 = arith.constant 1 : index
    %c0_176 = arith.constant 0 : index
    %c0_177 = arith.constant 0 : index
    %334 = vector.load %arg18[%c1_175, %c0_176, %c0_177] : memref<2x1x32xf32, #tpu.memory_space<vmem>>, vector<1x1x32xf32>
    %335 = vector.shape_cast %334 : vector<1x1x32xf32> to vector<1x32xf32>
    %c1_178 = arith.constant 1 : index
    %c0_179 = arith.constant 0 : index
    %c0_180 = arith.constant 0 : index
    %336 = vector.load %arg19[%c1_178, %c0_179, %c0_180] : memref<2x1x32xf32, #tpu.memory_space<vmem>>, vector<1x1x32xf32>
    %337 = vector.shape_cast %336 : vector<1x1x32xf32> to vector<1x32xf32>
    %cst_181 = arith.constant dense<0.000000e+00> : vector<8xf32>
    %338 = vector.multi_reduction <add>, %333, %cst_181 [1] : vector<8x32xf32> to vector<8xf32>
    %339 = vector.shape_cast %338 : vector<8xf32> to vector<8x1xf32>
    %cst_182 = arith.constant 3.200000e+01 : f32
    %340 = vector.broadcast %cst_182 : f32 to vector<8x1xf32>
    %341 = arith.divf %339, %340 : vector<8x1xf32>
    %342 = vector.broadcast %341 : vector<8x1xf32> to vector<8x32xf32>
    %343 = arith.subf %333, %342 : vector<8x32xf32>
    %344 = arith.mulf %343, %343 : vector<8x32xf32>
    %cst_183 = arith.constant dense<0.000000e+00> : vector<8xf32>
    %345 = vector.multi_reduction <add>, %344, %cst_183 [1] : vector<8x32xf32> to vector<8xf32>
    %346 = vector.shape_cast %345 : vector<8xf32> to vector<8x1xf32>
    %cst_184 = arith.constant 3.200000e+01 : f32
    %347 = vector.broadcast %cst_184 : f32 to vector<8x1xf32>
    %348 = arith.divf %346, %347 : vector<8x1xf32>
    %349 = vector.broadcast %341 : vector<8x1xf32> to vector<8x32xf32>
    %350 = arith.subf %333, %349 : vector<8x32xf32>
    %cst_185 = arith.constant 9.99999974E-6 : f32
    %351 = vector.broadcast %cst_185 : f32 to vector<8x1xf32>
    %352 = arith.addf %348, %351 : vector<8x1xf32>
    %353 = math.rsqrt %352 : vector<8x1xf32>
    %354 = vector.broadcast %353 : vector<8x1xf32> to vector<8x32xf32>
    %355 = arith.mulf %350, %354 : vector<8x32xf32>
    %356 = vector.broadcast %335 : vector<1x32xf32> to vector<8x32xf32>
    %357 = arith.mulf %355, %356 : vector<8x32xf32>
    %358 = vector.broadcast %337 : vector<1x32xf32> to vector<8x32xf32>
    %359 = arith.addf %357, %358 : vector<8x32xf32>
    %c0_186 = arith.constant 0 : index
    %c0_187 = arith.constant 0 : index
    %360 = vector.load %arg20[%c0_186, %c0_187] : memref<1x32xf32, #tpu.memory_space<vmem>>, vector<1x32xf32>
    %c0_188 = arith.constant 0 : index
    %c0_189 = arith.constant 0 : index
    %361 = vector.load %arg21[%c0_188, %c0_189] : memref<1x32xf32, #tpu.memory_space<vmem>>, vector<1x32xf32>
    %cst_190 = arith.constant dense<0.000000e+00> : vector<8xf32>
    %362 = vector.multi_reduction <add>, %359, %cst_190 [1] : vector<8x32xf32> to vector<8xf32>
    %363 = vector.shape_cast %362 : vector<8xf32> to vector<8x1xf32>
    %cst_191 = arith.constant 3.200000e+01 : f32
    %364 = vector.broadcast %cst_191 : f32 to vector<8x1xf32>
    %365 = arith.divf %363, %364 : vector<8x1xf32>
    %366 = vector.broadcast %365 : vector<8x1xf32> to vector<8x32xf32>
    %367 = arith.subf %359, %366 : vector<8x32xf32>
    %368 = arith.mulf %367, %367 : vector<8x32xf32>
    %cst_192 = arith.constant dense<0.000000e+00> : vector<8xf32>
    %369 = vector.multi_reduction <add>, %368, %cst_192 [1] : vector<8x32xf32> to vector<8xf32>
    %370 = vector.shape_cast %369 : vector<8xf32> to vector<8x1xf32>
    %cst_193 = arith.constant 3.200000e+01 : f32
    %371 = vector.broadcast %cst_193 : f32 to vector<8x1xf32>
    %372 = arith.divf %370, %371 : vector<8x1xf32>
    %373 = vector.broadcast %365 : vector<8x1xf32> to vector<8x32xf32>
    %374 = arith.subf %359, %373 : vector<8x32xf32>
    %cst_194 = arith.constant 9.99999974E-6 : f32
    %375 = vector.broadcast %cst_194 : f32 to vector<8x1xf32>
    %376 = arith.addf %372, %375 : vector<8x1xf32>
    %377 = math.rsqrt %376 : vector<8x1xf32>
    %378 = vector.broadcast %377 : vector<8x1xf32> to vector<8x32xf32>
    %379 = arith.mulf %374, %378 : vector<8x32xf32>
    %380 = vector.broadcast %360 : vector<1x32xf32> to vector<8x32xf32>
    %381 = arith.mulf %379, %380 : vector<8x32xf32>
    %382 = vector.broadcast %361 : vector<1x32xf32> to vector<8x32xf32>
    %383 = arith.addf %381, %382 : vector<8x32xf32>
    %c0_195 = arith.constant 0 : index
    %c0_196 = arith.constant 0 : index
    %c0_197 = arith.constant 0 : index
    %384 = vector.load %arg22[%c0_195, %c0_196, %c0_197] : memref<1x8x32xf32, #tpu.memory_space<vmem>>, vector<1x8x32xf32>
    %385 = vector.shape_cast %384 : vector<1x8x32xf32> to vector<8x32xf32>
    %386 = vector.shape_cast %383 : vector<8x32xf32> to vector<1x8x32xf32>
    tpu.vector_store %arg22[%c0_195, %c0_196, %c0_197], %386 {strides = array<i32>} : memref<1x8x32xf32, #tpu.memory_space<vmem>>, vector<1x8x32xf32>,
    return
  }
  func.func @transform_0(%arg0: i32) -> (i32, i32, i32) {
    %c0_i32 = arith.constant 0 : i32
    %c0_i32_0 = arith.constant 0 : i32
    %c0_i32_1 = arith.constant 0 : i32
    return %arg0, %c0_i32, %c0_i32_0 : i32, i32, i32
  }
  func.func @transform_1(%arg0: i32) -> (i32, i32, i32) {
    %c0_i32 = arith.constant 0 : i32
    %c0_i32_0 = arith.constant 0 : i32
    %c0_i32_1 = arith.constant 0 : i32
    %c0_i32_2 = arith.constant 0 : i32
    return %c0_i32, %c0_i32_0, %c0_i32_1 : i32, i32, i32
  }
  func.func @transform_2(%arg0: i32) -> (i32, i32, i32) {
    %c0_i32 = arith.constant 0 : i32
    %c0_i32_0 = arith.constant 0 : i32
    %c0_i32_1 = arith.constant 0 : i32
    %c0_i32_2 = arith.constant 0 : i32
    return %c0_i32, %c0_i32_0, %c0_i32_1 : i32, i32, i32
  }
  func.func @transform_3(%arg0: i32) -> (i32, i32, i32) {
    %c0_i32 = arith.constant 0 : i32
    %c0_i32_0 = arith.constant 0 : i32
    %c0_i32_1 = arith.constant 0 : i32
    %c0_i32_2 = arith.constant 0 : i32
    return %c0_i32, %c0_i32_0, %c0_i32_1 : i32, i32, i32
  }
  func.func @transform_4(%arg0: i32) -> (i32, i32, i32) {
    %c0_i32 = arith.constant 0 : i32
    %c0_i32_0 = arith.constant 0 : i32
    %c0_i32_1 = arith.constant 0 : i32
    %c0_i32_2 = arith.constant 0 : i32
    return %c0_i32, %c0_i32_0, %c0_i32_1 : i32, i32, i32
  }
  func.func @transform_5(%arg0: i32) -> (i32, i32, i32) {
    %c0_i32 = arith.constant 0 : i32
    %c0_i32_0 = arith.constant 0 : i32
    %c0_i32_1 = arith.constant 0 : i32
    %c0_i32_2 = arith.constant 0 : i32
    return %c0_i32, %c0_i32_0, %c0_i32_1 : i32, i32, i32
  }
  func.func @transform_6(%arg0: i32) -> (i32, i32, i32) {
    %c0_i32 = arith.constant 0 : i32
    %c0_i32_0 = arith.constant 0 : i32
    %c0_i32_1 = arith.constant 0 : i32
    %c0_i32_2 = arith.constant 0 : i32
    return %c0_i32, %c0_i32_0, %c0_i32_1 : i32, i32, i32
  }
  func.func @transform_7(%arg0: i32) -> (i32, i32, i32) {
    %c0_i32 = arith.constant 0 : i32
    %c0_i32_0 = arith.constant 0 : i32
    %c0_i32_1 = arith.constant 0 : i32
    %c0_i32_2 = arith.constant 0 : i32
    return %c0_i32, %c0_i32_0, %c0_i32_1 : i32, i32, i32
  }
  func.func @transform_8(%arg0: i32) -> (i32, i32, i32) {
    %c0_i32 = arith.constant 0 : i32
    %c0_i32_0 = arith.constant 0 : i32
    %c0_i32_1 = arith.constant 0 : i32
    %c0_i32_2 = arith.constant 0 : i32
    return %c0_i32, %c0_i32_0, %c0_i32_1 : i32, i32, i32
  }
  func.func @transform_9(%arg0: i32) -> (i32, i32, i32) {
    %c0_i32 = arith.constant 0 : i32
    %c0_i32_0 = arith.constant 0 : i32
    %c0_i32_1 = arith.constant 0 : i32
    %c0_i32_2 = arith.constant 0 : i32
    return %c0_i32, %c0_i32_0, %c0_i32_1 : i32, i32, i32
  }
  func.func @transform_10(%arg0: i32) -> (i32, i32, i32) {
    %c0_i32 = arith.constant 0 : i32
    %c0_i32_0 = arith.constant 0 : i32
    %c0_i32_1 = arith.constant 0 : i32
    %c0_i32_2 = arith.constant 0 : i32
    return %c0_i32, %c0_i32_0, %c0_i32_1 : i32, i32, i32
  }
  func.func @transform_11(%arg0: i32) -> (i32, i32, i32) {
    %c0_i32 = arith.constant 0 : i32
    %c0_i32_0 = arith.constant 0 : i32
    %c0_i32_1 = arith.constant 0 : i32
    %c0_i32_2 = arith.constant 0 : i32
    return %c0_i32, %c0_i32_0, %c0_i32_1 : i32, i32, i32
  }
  func.func @transform_12(%arg0: i32) -> (i32, i32, i32) {
    %c0_i32 = arith.constant 0 : i32
    %c0_i32_0 = arith.constant 0 : i32
    %c0_i32_1 = arith.constant 0 : i32
    %c0_i32_2 = arith.constant 0 : i32
    return %c0_i32, %c0_i32_0, %c0_i32_1 : i32, i32, i32
  }
  func.func @transform_13(%arg0: i32) -> (i32, i32, i32) {
    %c0_i32 = arith.constant 0 : i32
    %c0_i32_0 = arith.constant 0 : i32
    %c0_i32_1 = arith.constant 0 : i32
    %c0_i32_2 = arith.constant 0 : i32
    return %c0_i32, %c0_i32_0, %c0_i32_1 : i32, i32, i32
  }
  func.func @transform_14(%arg0: i32) -> (i32, i32, i32) {
    %c0_i32 = arith.constant 0 : i32
    %c0_i32_0 = arith.constant 0 : i32
    %c0_i32_1 = arith.constant 0 : i32
    %c0_i32_2 = arith.constant 0 : i32
    return %c0_i32, %c0_i32_0, %c0_i32_1 : i32, i32, i32
  }
  func.func @transform_15(%arg0: i32) -> (i32, i32, i32) {
    %c0_i32 = arith.constant 0 : i32
    %c0_i32_0 = arith.constant 0 : i32
    %c0_i32_1 = arith.constant 0 : i32
    %c0_i32_2 = arith.constant 0 : i32
    return %c0_i32, %c0_i32_0, %c0_i32_1 : i32, i32, i32
  }
  func.func @transform_16(%arg0: i32) -> (i32, i32, i32) {
    %c0_i32 = arith.constant 0 : i32
    %c0_i32_0 = arith.constant 0 : i32
    %c0_i32_1 = arith.constant 0 : i32
    %c0_i32_2 = arith.constant 0 : i32
    return %c0_i32, %c0_i32_0, %c0_i32_1 : i32, i32, i32
  }
  func.func @transform_17(%arg0: i32) -> (i32, i32, i32) {
    %c0_i32 = arith.constant 0 : i32
    %c0_i32_0 = arith.constant 0 : i32
    %c0_i32_1 = arith.constant 0 : i32
    %c0_i32_2 = arith.constant 0 : i32
    return %c0_i32, %c0_i32_0, %c0_i32_1 : i32, i32, i32
  }
  func.func @transform_18(%arg0: i32) -> (i32, i32, i32) {
    %c0_i32 = arith.constant 0 : i32
    %c0_i32_0 = arith.constant 0 : i32
    %c0_i32_1 = arith.constant 0 : i32
    %c0_i32_2 = arith.constant 0 : i32
    return %c0_i32, %c0_i32_0, %c0_i32_1 : i32, i32, i32
  }
  func.func @transform_19(%arg0: i32) -> (i32, i32) {
    %c0_i32 = arith.constant 0 : i32
    %c0_i32_0 = arith.constant 0 : i32
    %c0_i32_1 = arith.constant 0 : i32
    return %c0_i32, %c0_i32_0 : i32, i32
  }
  func.func @transform_20(%arg0: i32) -> (i32, i32) {
    %c0_i32 = arith.constant 0 : i32
    %c0_i32_0 = arith.constant 0 : i32
    %c0_i32_1 = arith.constant 0 : i32
    return %c0_i32, %c0_i32_0 : i32, i32
  }
  func.func @transform_21(%arg0: i32) -> (i32, i32, i32) {
    %c0_i32 = arith.constant 0 : i32
    %c0_i32_0 = arith.constant 0 : i32
    %c0_i32_1 = arith.constant 0 : i32
    return %arg0, %c0_i32, %c0_i32_0 : i32, i32, i32
  }
}

</mosaic_0001>

<bundles_post_ra>
// kernel: tpu_custom_call.1
= control target key start
LH: loop header
LB: loop body
LE: loop exit
PB: predicated region body
PF: predicated region fallthrough
CT: control target
= control target key end

     0   :  { %s3344_s0 = inlined_call_operand.hbm [shape: f32[2,8,32], index: 0, kind: input, shape index: {}]   ;;  %s3345_s1 = inlined_call_operand.hbm [shape: f32[1,8,32], index: 1, kind: input, shape index: {}]   ;;  %s3346_s2 = inlined_call_operand.hbm [shape: f32[4,1,32], index: 2, kind: input, shape index: {}]   ;;  %s3347_s3 = inlined_call_operand.vmem [shape: bf16[2,32,32], index: 3, kind: input, shape index: {}]   ;;  %s3348_s4 = inlined_call_operand.vmem [shape: bf16[2,32,32], index: 4, kind: input, shape index: {}]   ;;  %s3349_s5 = inlined_call_operand.vmem [shape: bf16[2,32,32], index: 5, kind: input, shape index: {}]   ;;  %s3350_s6 = inlined_call_operand.vmem [shape: f32[2,1,32], index: 6, kind: input, shape index: {}]   ;;  %s3351_s7 = inlined_call_operand.vmem [shape: f32[2,1,32], index: 7, kind: input, shape index: {}]   ;;  %s3352_s8 = inlined_call_operand.vmem [shape: f32[2,1,32], index: 8, kind: input, shape index: {}]   ;;  %s3353_s9 = inlined_call_operand.hbm [shape: bf16[2,32,32], index: 9, kind: input, shape index: {}]   ;;  %s3354_s10 = inlined_call_operand.vmem [shape: f32[2,1,32], index: 10, kind: input, shape index: {}]   ;;  %s3355_s11 = inlined_call_operand.hbm [shape: f32[2,1,32], index: 11, kind: input, shape index: {}]   ;;  %s3356_s12 = inlined_call_operand.vmem [shape: f32[2,1,32], index: 12, kind: input, shape index: {}]   ;;  %s3357_s13 = inlined_call_operand.hbm [shape: bf16[2,32,64], index: 13, kind: input, shape index: {}]   ;;  %s3358_s14 = inlined_call_operand.vmem [shape: f32[2,1,64], index: 14, kind: input, shape index: {}]   ;;  %s3359_s15 = inlined_call_operand.vmem [shape: bf16[2,64,32], index: 15, kind: input, shape index: {}]   ;;  %s3360_s16 = inlined_call_operand.vmem [shape: f32[2,1,32], index: 16, kind: input, shape index: {}]   ;;  %s3361_s17 = inlined_call_operand.hbm [shape: f32[2,1,32], index: 17, kind: input, shape index: {}]   ;;  %s3362_s18 = inlined_call_operand.vmem [shape: f32[2,1,32], index: 18, kind: input, shape index: {}]   ;;  %s3363_s19 = inlined_call_operand.vmem [shape: f32[1,32], index: 19, kind: input, shape index: {}]   ;;  %s3364_s20 = inlined_call_operand.vmem [shape: f32[1,32], index: 20, kind: input, shape index: {}]   ;;  %s3365_s21 = inlined_call_operand.hbm [shape: f32[2,8,32], index: 21, kind: output, shape index: {}]  }
   0x1   :  { %3376 = sst [smem:[#allocation21_spill]] %s3344_s0 }
   0x2   :  { %3377 = sst [smem:[#allocation22_spill]] %s3345_s1 }
   0x3   :  { %3378 = sst [smem:[#allocation23_spill]] %s3346_s2 }
   0x4   :  { %3379 = sst [smem:[#allocation24_spill]] %s3347_s3 }
   0x5   :  { %3380 = sst [smem:[#allocation25_spill]] %s3348_s4 }
   0x6   :  { %3381 = sst [smem:[#allocation26_spill]] %s3349_s5 }
   0x7   :  { %3382 = sst [smem:[#allocation27_spill]] %s3350_s6 }
   0x8   :  { %3383 = sst [smem:[#allocation28_spill]] %s3351_s7 }
   0x9   :  { %3384 = sst [smem:[#allocation29_spill]] %s3352_s8 }
   0xa   :  { %3385 = sst [smem:[#allocation30_spill]] %s3353_s9 }
   0xb   :  { %3386 = sst [smem:[#allocation31_spill]] %s3354_s10 }
   0xc   :  { %3387 = sst [smem:[#allocation32_spill]] %s3355_s11 }
   0xd   :  { %3388 = sst [smem:[#allocation33_spill]] %s3357_s13 }
   0xe   :  { %3389 = sst [smem:[#allocation34_spill]] %s3359_s15 }
   0xf   :  { %3390 = sst [smem:[#allocation35_spill]] %s3360_s16 }
  0x10   :  { %3391 = sst [smem:[#allocation36_spill]] %s3361_s17 }
  0x11   :  { %3392 = sst [smem:[#allocation37_spill]] %s3362_s18 }
  0x12   :  { %3393 = sst [smem:[#allocation38_spill]] %s3363_s19 }
  0x13   :  { %3394 = sst [smem:[#allocation39_spill]] %s3364_s20 }
  0x14   :  { %3395 = sst [smem:[#allocation40_spill]] %s3365_s21 }
  0x15   :  { %26 = vsyncpa [#allocation3], 0 }
  0x16   :  { %28 = vsyncpa [#allocation3 + $0x1], 0 }
  0x17   :  { %29 = vsyncpa [#allocation6], 0 }
  0x18   :  { %30 = vsyncpa [#allocation9], 0 }
  0x19   :  { %31 = vsyncpa [#allocation12], 0 }
  0x1a   :  { %32 = vsyncpa [#allocation4], 0 }
  0x1b   :  { %34 = vsyncpa [#allocation4 + $0x1], 0  ;;  %s2908_s2 = smov 0   ;;  %s2910_s25 = smov 0  }
  0x1c   :  { %s2912_s26 = smov 0   ;;  %s2914_s27 = smov 0  }
  0x1d LB: > { %s3396_s29 = sld [smem:[#allocation22_spill]]  ;;  %s2932_s4 = sadd.s32 4294967295, %s2785_s27   ;;  %s2785_s27 = sphi %s2914_s27, %s3430_s27   ;;  %s2781_s26 = sphi %s2912_s26, %s3429_s26   ;;  %s2777_s25 = sphi %s2910_s25, %s3428_s25   ;;  %s2773_s2 = sphi %s2908_s2, %s3427_s2  }
  0x1e   : > { %p2086_p0 = scmp.ge.s32.totalorder %s2785_s27, 1  ;;  %p61_p1 = scmp.eq.s32.totalorder %s2932_s4, 0 }
  0x1f   : > { %p517_p2 = scmp.lt.s32.totalorder %s2785_s27, 3  ;;  %s2787_s5 = smov [#allocation5]  }
  0x20   : > { %s531_s22 = sshll.u32 %s2787_s5, 4  ;;  %s3398_s9 = sld [smem:[#allocation30_spill]]  ;;  %s532_s22 = int_to_ptr.vmem [resolvable:$true] %s531_s22 }
  0x21   : > { %p2937_p3 = pnand %p2086_p0, %p517_p2  ;;  %s2788_s28 = smov [#allocation8]  }
  0x22   : > { %s2789_s5 = smov 64   ;;  %s2790_s20 = smov 4  }
  0x23   : > { %s529_s0 = sshll.u32 %s3396_s29, 4  ;;  %p2335_p5 = pneg %p2937_p3  ;;  %s530_s0 = int_to_ptr.hbm [resolvable:$true] %s529_s0 }
  0x24   : > { %s574_s29 = sshll.u32 %s2788_s28, 4  ;;  %s3400_s13 = sld [smem:[#allocation33_spill]]  ;;  %s575_s29 = int_to_ptr.vmem [resolvable:$true] %s574_s29 }
  0x25   : > { %p2949_p6 = pnand %p2335_p5, %p61_p1  ;;  %s2791_s21 = smov [#allocation11]  }
  0x26   : > { %s572_s24 = sshll.u32 %s3398_s9, 4  ;;  %s608_s19 = sshll.u32 %s2791_s21, 4  ;;  %s573_s24 = int_to_ptr.hbm [resolvable:$true] %s572_s24  ;;  %s609_s19 = int_to_ptr.vmem [resolvable:$true] %s608_s19 }
  0x27   : > { %2338 = dma.hbm_to_vmem [thread:$0]  (!%p2949_p6), %s530_s0, 128, %s532_s22, [#allocation6]  }
  0x28   : > { %2344 = dma.hbm_to_vmem [thread:$0]  (!%p2949_p6), %s573_s24, 512, %s575_s29, [#allocation9], %s2789_s5, %s2789_s5, %s2790_s20  }
  0x29   : > { %s3401_s15 = sld [smem:[#allocation23_spill]]  ;;  %s2792_s0 = smov [#allocation7]  }
  0x2a   : > { %s606_s9 = sshll.u32 %s3400_s13, 4  ;;  %s542_s22 = sshll.u32 %s2792_s0, 4  ;;  %s607_s9 = int_to_ptr.hbm [resolvable:$true] %s606_s9  ;;  %s543_s22 = int_to_ptr.vmem [resolvable:$true] %s542_s22 }
  0x2b   : > { %2350 = dma.hbm_to_vmem [thread:$0]  (!%p2949_p6), %s607_s9, 512, %s609_s19, [#allocation12], %s2789_s5, %s2789_s5, %s2790_s20  }
  0x2c   : > { %s2793_s24 = smov 16   ;;  %s2794_s29 = smov 1  }
  0x2d   : > { %s3402_s11 = sld [smem:[#allocation32_spill]]  ;;  %s2795_s9 = smov [#allocation10]  }
  0x2e   : > { %s3403_s17 = sld [smem:[#allocation36_spill]]  ;;  %s2796_s5 = smov [#allocation13]  }
  0x2f   : > { %s540_s28 = sshll.u32 %s3401_s15, 4  ;;  %s591_s15 = sshll.u32 %s2795_s9, 4  ;;  %s541_s28 = int_to_ptr.hbm [resolvable:$true] %s540_s28  ;;  %s592_s15 = int_to_ptr.vmem [resolvable:$true] %s591_s15 }
  0x30   : > { %2341 = dma.hbm_to_vmem [thread:$0]  (!%p2949_p6), %s541_s28, 64, %s543_s22, [#allocation6], %s2793_s24, %s2793_s24, %s2794_s29  }
  0x31   : > { %s631_s1 = sshll.u32 %s2796_s5, 4  ;;  %s2085_s28 = sadd.s32 4294967294, %s2785_s27   ;;  %s632_s1 = int_to_ptr.vmem [resolvable:$true] %s631_s1 }
  0x32   : > { %s2979_s0 = sadd.s32 1, %s2785_s27   ;;  %s47_s21 = sadd.s32 1, %s2781_s26 }
  0x33   : > { %s589_s16 = sshll.u32 %s3402_s11, 4  ;;  %s44_s22 = ssub.s32 %s2785_s27, %s2979_s0  ;;  %s590_s16 = int_to_ptr.hbm [resolvable:$true] %s589_s16 }
  0x34   : > { %s629_s20 = sshll.u32 %s3403_s17, 4  ;;  %p45_p7 = scmp.eq.s32.totalorder %s44_s22, 0  ;;  %s630_s20 = int_to_ptr.hbm [resolvable:$true] %s629_s20 }
  0x35   : > { %2347 = dma.hbm_to_vmem [thread:$0]  (!%p2949_p6), %s590_s16, 32, %s592_s15, [#allocation9], %s2793_s24, %s2793_s24, %s2794_s29  }
  0x36   : > { %2353 = dma.hbm_to_vmem [thread:$0]  (!%p2949_p6), %s630_s20, 32, %s632_s1, [#allocation12], %s2793_s24, %s2793_s24, %s2794_s29  }
  0x37   : > { %p54_p8 = scmp.ne.s32.totalorder %s2781_s26, %s2777_s25  ;;  %p55_p9 = scmp.eq.s32.totalorder %s2785_s27, 0 }
  0x38   : > { %p60_p10 = scmp.ne.s32.totalorder %s2777_s25, %s2773_s2  ;;  %p504_p13 = scmp.eq.s32.totalorder %s2932_s4, 1 }
  0x39   : > { %s2990_s23 = scalar_select %p45_p7, %s2781_s26, %s47_s21  }
  0x3a   : > { %p2992_p11 = por %p55_p9, %p54_p8  ;;  %p2998_p12 = por %p61_p1, %p60_p10 }
  0x3b   : > { %3404 = sst [smem:[#allocation20_spill]] %s2990_s23  ;;  %p510_p0 = scmp.eq.s32.totalorder %s2085_s28, 1 }
  0x3c   : > { %p2368_p2 = scmp.lt.s32.totalorder %s2785_s27, 2  ;;  %s654_s24 = sand.u32 1, %s2781_s26  }
  0x3d   : > { %p3005_p5 = por %p504_p13, %p54_p8  ;;  %p3009_p6 = por %p510_p0, %p60_p10 }
  0x3e   : > { %s2094_s15 = sshll.u32 %s654_s24, 3  ;;  %s2095_s18 = sshll.u32 %s2785_s27, 3 }
  0x3f   : > { %s3409_s5 = sld [smem:[#allocation21_spill]]  ;;  %s658_s22 = scalar_lea.vmem [#allocation2], %s2094_s15 }
  0x40   : > { %s666_s21 = sshll.u32 %s658_s22, 4  ;;  %p3019_p7 = pnand %p2368_p2, %p2992_p11  ;;  %s667_s21 = int_to_ptr.vmem [resolvable:$true] %s666_s21 }
  0x41   : > { %s655_s13 = scalar_lea.sflag [#allocation3], %s654_s24 }
  0x42   : > { %p2681_p9 = pneg %p3019_p7 }
  0x45   : > { %s662_s1 = scalar_lea.hbm %s3409_s5, %s2095_s18  ;;  %s2684_s19 = scalar_lea.hbm %s3409_s5, 16 }
  0x46   : > { %s664_s11 = sshll.u32 %s662_s1, 4  ;;  %s665_s11 = int_to_ptr.hbm [resolvable:$true] %s664_s11 }
  0x47   : > { %s2677_s17 = sshra.s32 %s665_s11, 4  ;;  %s2678_s17 = int_to_ptr.hbm [resolvable:$true] %s2677_s17 }
  0x48   : > { %s2679_s23 = scalar_lea.hbm %s2678_s17, 8  ;;  %p2685_p11 = scmp.lt.s32.totalorder %s2678_s17, %s3409_s5 }
  0x49   : > { %p2680_p8 = scmp.ne.s32.totalorder %s2678_s17, %s2679_s23  ;;  %p2686_p0 = scmp.lt.s32.totalorder %s2684_s19, %s2679_s23 }
  0x4b   : > { %p2682_p10 = pnand %p2681_p9, %p2680_p8  ;;  %p2687_p2 = por %p2686_p0, %p2685_p11 }
  0x4d   : > { %p2683_p13 = pneg %p2682_p10 }
  0x4f   : > { %p2688_p4 = pnand %p2687_p2, %p2683_p13 }
  0x51   : > { %2691 = shalt.err (!%p2688_p4)
}
  0x52   : > { %2357 = dma.hbm_to_vmem [thread:$0]  (!%p3019_p7), %s665_s11, 128, %s667_s21, %s655_s13  }
  0x53   : > { %675 = sbr.rel (%p2937_p3) target bundleno = 3807 (0xedf), region = 104  ;;  %s3036_s24 = sand.u32 (!%p2937_p3), 1, %s2777_s25  }
  0x54   : > { %s3374_s1 = sshll.u32 (!%p2937_p3), %s3036_s24, 3  ;;  %s678_s22 = scalar_lea.sflag (!%p2937_p3), [#allocation3], %s3036_s24 }
  0x55   : > { %s681_s17 = scalar_lea.vmem (!%p2937_p3), [#allocation2], %s3374_s1 }
  0x58   : > { %2752 = dma.done.wait (%p2998_p12), %s678_s22, 128  }
  0x59   : > { %2754 = vsyncadd (%p2998_p12), %s678_s22, 4294967168 }
  0x5a   : > { %2756 = dma.done.wait (%p61_p1), [#allocation6], 192  }
  0x5b   : > { %2758 = vsyncadd (%p61_p1), [#allocation6], 4294967104 }
  0x5c   : > { %2760 = dma.done.wait (%p61_p1), [#allocation9], 544  }
  0x5d   : > { %2762 = vsyncadd (%p61_p1), [#allocation9], 4294966752 }
  0x5e   : > { %2764 = dma.done.wait (%p61_p1), [#allocation12], 544  }
  0x5f   : > { %2766 = vsyncadd (%p61_p1), [#allocation12], 4294966752  ;;  %s3411_s30 = sld [smem:[#allocation24_spill]]  ;;  %v772_v3 = vld [vmem:[%s681_s17] sm:$0xff]  ;;  %v773_v4 = vld [vmem:[#allocation5] sm:$0xff]  ;;  %vm800_vm0 = vcmask 261120  }
  0x60   : > { %s3412_s21 = sld [smem:[#allocation25_spill]]  ;;  %v3070_v6 = vadd.f32 %v773_v4, %v772_v3  ;;  %v3082_v10 = vld [vmem:[#allocation7] ss:$0 sm:$0xff]  ;;  %v3087_v18 = vld [vmem:[#allocation7 + $0x1] ss:$0 sm:$0xff]  ;;  %vm947_vm1 = vcmask 64512  }
  0x61   : > { %s3413_s6 = sld [smem:[#allocation27_spill]]  ;;  %v3091_v20 = vld [vmem:[#allocation7 + $0x2] ss:$0 sm:$0xff]  ;;  %v3095_v22 = vld [vmem:[#allocation7 + $0x3] ss:$0 sm:$0xff]  ;;  %s2276_s15 = sshll.u32 %s2932_s4, 3 }
  0x62   : > { %v779_v7 = vpack.c.bf16 %v3070_v6, %v3070_v6  ;;  %s3414_s7 = sld [smem:[#allocation28_spill]]  ;;  %s3424_s4 = sshll.u32 %s3036_s24, 3 }
  0x63   : > { %s3415_s23 = sld [smem:[#allocation26_spill]]  ;;  %s1943_s1 = scalar_lea.sflag [#allocation4], %s3036_s24 }
  0x64   : > { %s3416_s8 = sld [smem:[#allocation29_spill]] }
  0x65   : > { %v2280_v0 = vld [vmem:[%s3411_s30 + $0x8] sm:$0xff]  ;;  %v2279_v2 = vld [vmem:[%s3411_s30] sm:$0xff]  ;;  %s3417_s10 = sld [smem:[#allocation31_spill]] }
  0x66   : > { %v2282_v1 = vld [vmem:[%s3412_s21 + $0x8] sm:$0xff]  ;;  %810 = vmatpush.bf16.msra.mxu0 %v2280_v0  ;;  %v2281_v5 = vld [vmem:[%s3412_s21] sm:$0xff]  ;;  %s3418_s28 = sld [smem:[#allocation34_spill]] }
  0x67   : > { %843 = vmatpush.bf16.msra.mxu1 %v2282_v1  ;;  %v2419_v8 = vld [vmem:[%s3413_s6] ss:$0 sm:$0xff]  ;;  %s3419_s13 = sld [smem:[#allocation35_spill]] }
  0x68   : > { %v2420_v9 = vld [vmem:[%s3414_s7] ss:$0 sm:$0xff]  ;;  %s3420_s19 = sld [smem:[#allocation37_spill]] }
  0x69   : > { %v2284_v24 = vld [vmem:[%s3415_s23 + $0x8] sm:$0xff]  ;;  %v2283_v37 = vld [vmem:[%s3415_s23] sm:$0xff]  ;;  %s3421_s20 = sld [smem:[#allocation38_spill]] }
  0x6a   : > { %811 = vmatpush.bf16.msra.mxu0 %v2279_v2  ;;  %876 = vmatpush.bf16.msra.mxu2 %v2284_v24  ;;  %v2425_v59 = vld [vmem:[%s3416_s8] ss:$0 sm:$0xff]  ;;  %s3422_s17 = sld [smem:[#allocation40_spill]] }
  0x6b   : > { %844 = vmatpush.bf16.msra.mxu1 %v2281_v5 }
  0x6d   : > { %2113 = vmatmul.msk.bf16.vlgmr.msra.gmra.mxu0 %vm800_vm0, %v779_v7 }
  0x6e   : > { %2122 = vmatmul.msk.bf16.vlgmr.msra.gmra.mxu1 %vm800_vm0, %v779_v7  ;;  %877 = vmatpush.bf16.msra.mxu2 %v2283_v37 }
  0x70   : > { %s1953_s11 = scalar_lea.hbm %s3422_s17, %s2276_s15 }
  0x71   : > { %2131 = vmatmul.msk.bf16.vlgmr.msra.gmra.mxu2 %vm800_vm0, %v779_v7 }
  0xea   : > { %v813_v11 = vpop.f32.mrf.mxu0 }
  0xeb   : > { %v846_v12 = vpop.f32.mrf.mxu1  ;;  %v814_v13 = vadd.f32 %v2419_v8, %v813_v11 }
  0xec   : > { %v847_v14 = vadd.f32 %v2420_v9, %v846_v12 }
  0xed   : > { %v895_v15 = vmul.f32 %v3082_v10, %v814_v13  ;;  %v896_v19 = vmul.f32 %v3087_v18, %v814_v13  ;;  %v897_v21 = vmul.f32 %v3091_v20, %v814_v13  ;;  %v898_v23 = vmul.f32 %v3095_v22, %v814_v13 }
  0xee   : > { %2132 = vmatpush.xpose.msk.msra.mxu3 %vm800_vm0, %v847_v14 }
  0xf1   : > { %2133 = vmatmul.msk.f32.vlgmr.msra.gmra.mxu3 %vm800_vm0, %v895_v15 }
  0xf2   : > { %v815_v16 = vpop.f32.mrf.mxu0 }
  0xf3   : > { %v848_v17 = vpop.f32.mrf.mxu1 }
  0xf4   : > { %v879_v58 = vpop.f32.mrf.mxu2 }
  0xf5   : > { %v880_v60 = vadd.f32 %v2425_v59, %v879_v58 }
  0xf7   : > { %1071 = vmatpush.msrb.mxu0 %v880_v60 }
  0xf9   : > { %2134 = vmatmul.msk.f32.gmra.mxu3 %vm800_vm0, %v896_v19 }
  0xfc   : > { %v881_v61 = vpop.f32.mrf.mxu2 }
 0x101   : > { %2135 = vmatmul.msk.f32.gmra.mxu3 %vm800_vm0, %v897_v21 }
 0x109   : > { %2136 = vmatmul.msk.f32.gmra.mxu3 %vm800_vm0, %v898_v23 }
 0x174   : > { %v931_v25 = vpop.f32.mrf.mxu3 }
 0x175   : > { %v943_v26 = vmul.f32 0.35355338, %v931_v25 }
 0x177   : > { %v948_v27 = vsel %vm947_vm1, %v943_v26, -inf }
 0x178   : > { %949 = vmax.xlane.f32.xlu0 %v948_v27 }
 0x17c   : > { %v934_v28 = vpop.f32.mrf.mxu3 }
 0x17d   : > { %v944_v29 = vmul.f32 0.35355338, %v934_v28 }
 0x17f   : > { %v951_v30 = vsel %vm947_vm1, %v944_v29, -inf }
 0x180   : > { %952 = vmax.xlane.f32.xlu0 %v951_v30 }
 0x184   : > { %v937_v31 = vpop.f32.mrf.mxu3 }
 0x185   : > { %v945_v32 = vmul.f32 0.35355338, %v937_v31 }
 0x187   : > { %v954_v33 = vsel %vm947_vm1, %v945_v32, -inf }
 0x188   : > { %955 = vmax.xlane.f32.xlu1 %v954_v33 }
 0x18c   : > { %v940_v34 = vpop.f32.mrf.mxu3 }
 0x18d   : > { %v946_v35 = vmul.f32 0.35355338, %v940_v34 }
 0x18f   : > { %v957_v36 = vsel %vm947_vm1, %v946_v35, -inf }
 0x190   : > { %958 = vmax.xlane.f32.xlu1 %v957_v36 }
 0x1eb   : > { %v950_v38 = vpop.xlane.xlu0 %949 }
 0x1ec   : > { %v960_v39 = vsub.f32 %v943_v26, %v950_v38 }
 0x1ee   : > { %v964_v40 = vmul.f32 1.442695, %v960_v39 }
 0x1f0   : > { %2445 = vpow2.f32 %v964_v40 }
 0x1f3   : > { %v953_v41 = vpop.xlane.xlu0 %952 }
 0x1f4   : > { %v961_v42 = vsub.f32 %v944_v29, %v953_v41 }
 0x1f6   : > { %v2446_v43 = vpop.eup %2445  ;;  %v966_v44 = vmul.f32 1.442695, %v961_v42 }
 0x1f7   : > { %v972_v45 = vsel %vm947_vm1, %v2446_v43, 0.0 }
 0x1f8   : > { %2447 = vpow2.f32 %v966_v44  ;;  %973 = vadd.xlane.f32.xlu2 %v972_v45 }
 0x1fb   : > { %v956_v46 = vpop.xlane.xlu1 %955 }
 0x1fc   : > { %v962_v47 = vsub.f32 %v945_v32, %v956_v46 }
 0x1fe   : > { %v2448_v48 = vpop.eup %2447  ;;  %v968_v49 = vmul.f32 1.442695, %v962_v47 }
 0x1ff   : > { %v975_v50 = vsel %vm947_vm1, %v2448_v48, 0.0 }
 0x200   : > { %2449 = vpow2.f32 %v968_v49  ;;  %976 = vadd.xlane.f32.xlu2 %v975_v50 }
 0x203   : > { %v959_v51 = vpop.xlane.xlu1 %958 }
 0x204   : > { %v963_v52 = vsub.f32 %v946_v35, %v959_v51  ;;  %v2286_v51 = vld [vmem:[#allocation8 + $0x8] sm:$0xff] }
 0x205   : > { %1126 = vmatpush.bf16.msrb.mxu1 %v2286_v51 }
 0x206   : > { %v3112_v53 = vpop.eup %2449  ;;  %v970_v54 = vmul.f32 1.442695, %v963_v52  ;;  %v2285_v52 = vld [vmem:[#allocation8] sm:$0xff] }
 0x207   : > { %v978_v55 = vsel %vm947_vm1, %v3112_v53, 0.0 }
 0x208   : > { %2451 = vpow2.f32 %v970_v54  ;;  %979 = vadd.xlane.f32.xlu0 %v978_v55 }
 0x209   : > { %1127 = vmatpush.bf16.msrb.mxu1 %v2285_v52 }
 0x20e   : > { %v3116_v56 = vpop.eup %2451 }
 0x20f   : > { %v981_v57 = vsel %vm947_vm1, %v3116_v56, 0.0 }
 0x210   : > { %982 = vadd.xlane.f32.xlu1 %v981_v57 }
 0x26b   : > { %v974_v62 = vpop.xlane.xlu2 %973 }
 0x26c   : > { %2453 = vrcp.f32 %v974_v62  ;;  %v995_v3 = vand.u32 2147483648, %v974_v62  ;;  %v993_v5 = vand.u32 2147483647, %v974_v62  ;;  %vm989_vm3 = vweird.f32 %v974_v62 }
 0x26e   : > { %v996_v9 = vor.u32 1.1754944e-38, %v995_v3  ;;  %vm994_vm5 = vcmp.eq.f32.partialorder %v993_v5, 8.507059e+37  ;;  %v2426_v5 = vld [vmem:[%s3417_s10] ss:$0 sm:$0xff] }
 0x272   : > { %v2454_v63 = vpop.eup %2453 }
 0x273   : > { %v985_v0 = vmul.f32 %v2454_v63, %v974_v62  ;;  %v977_v1 = vpop.xlane.xlu2 %976  ;;  %vm990_vm2 = vweird.f32 %v2454_v63 }
 0x274   : > { %2455 = vrcp.f32 %v977_v1  ;;  %vm991_vm4 = vmor %vm989_vm3, %vm990_vm2  ;;  %v1010_v17 = vand.u32 2147483648, %v977_v1  ;;  %v1008_v21 = vand.u32 2147483647, %v977_v1  ;;  %vm1004_vm7 = vweird.f32 %v977_v1 }
 0x275   : > { %v986_v2 = vsub.f32 1.0, %v985_v0 }
 0x276   : > { %v1011_v25 = vor.u32 1.1754944e-38, %v1010_v17  ;;  %vm1009_vm9 = vcmp.eq.f32.partialorder %v1008_v21, 8.507059e+37 }
 0x277   : > { %v987_v4 = vmul.f32 %v2454_v63, %v986_v2 }
 0x279   : > { %v988_v7 = vadd.f32 %v2454_v63, %v987_v4 }
 0x27a   : > { %v2456_v8 = vpop.eup %2455 }
 0x27b   : > { %v1000_v11 = vmul.f32 %v2456_v8, %v977_v1  ;;  %v980_v12 = vpop.xlane.xlu0 %979  ;;  %v992_v13 = vsel %vm991_vm4, %v2454_v63, %v988_v7  ;;  %vm1005_vm6 = vweird.f32 %v2456_v8 }
 0x27c   : > { %2457 = vrcp.f32 %v980_v12  ;;  %v997_v14 = vsel %vm994_vm5, %v996_v9, %v992_v13  ;;  %vm1006_vm8 = vmor %vm1004_vm7, %vm1005_vm6  ;;  %v1025_v32 = vand.u32 2147483648, %v980_v12  ;;  %v1023_v34 = vand.u32 2147483647, %v980_v12 }
 0x27d   : > { %v1001_v15 = vsub.f32 1.0, %v1000_v11  ;;  %v998_v16 = vmul.f32 %v2446_v43, %v997_v14  ;;  %vm1019_vm11 = vweird.f32 %v980_v12  ;;  %v2797_v13 = vmov 32.0  }
 0x27e   : > { %v1026_v37 = vor.u32 1.1754944e-38, %v1025_v32  ;;  %vm1024_vm13 = vcmp.eq.f32.partialorder %v1023_v34, 8.507059e+37 }
 0x27f   : > { %v1002_v19 = vmul.f32 %v2456_v8, %v1001_v15  ;;  %2137 = vmatmul.msk.f32.vlgmr.msrb.gmra.mxu0 %vm947_vm1, %v998_v16 }
 0x281   : > { %v1003_v23 = vadd.f32 %v2456_v8, %v1002_v19 }
 0x282   : > { %v2458_v24 = vpop.eup %2457 }
 0x283   : > { %v1015_v26 = vmul.f32 %v2458_v24, %v980_v12  ;;  %v983_v27 = vpop.xlane.xlu1 %982  ;;  %v1007_v28 = vsel %vm1006_vm8, %v2456_v8, %v1003_v23  ;;  %vm1020_vm10 = vweird.f32 %v2458_v24 }
 0x284   : > { %2459 = vrcp.f32 %v983_v27  ;;  %v1012_v29 = vsel %vm1009_vm9, %v1011_v25, %v1007_v28  ;;  %vm1021_vm12 = vmor %vm1019_vm11, %vm1020_vm10  ;;  %v1040_v43 = vand.u32 2147483648, %v983_v27  ;;  %v1038_v45 = vand.u32 2147483647, %v983_v27  ;;  %v2287_v28 = vld [vmem:[#allocation11] sm:$0xff] }
 0x285   : > { %v1016_v30 = vsub.f32 1.0, %v1015_v26  ;;  %v1013_v31 = vmul.f32 %v2448_v48, %v1012_v29  ;;  %vm1034_vm15 = vweird.f32 %v983_v27  ;;  %2461 = vrcp.f32 %v2797_v13 }
 0x286   : > { %v1041_v47 = vor.u32 1.1754944e-38, %v1040_v43  ;;  %vm1039_vm3 = vcmp.eq.f32.partialorder %v1038_v45, 8.507059e+37  ;;  %v2429_v45 = vld [vmem:[%s3358_s14] ss:$0 sm:$0xff] }
 0x287   : > { %v1017_v33 = vmul.f32 %v2458_v24, %v1016_v30  ;;  %2138 = vmatmul.msk.f32.gmra.mxu0 %vm947_vm1, %v1013_v31 }
 0x289   : > { %v1018_v35 = vadd.f32 %v2458_v24, %v1017_v33 }
 0x28a   : > { %v2460_v36 = vpop.eup %2459 }
 0x28b   : > { %v1030_v38 = vmul.f32 %v2460_v36, %v983_v27  ;;  %v1022_v39 = vsel %vm1021_vm12, %v2458_v24, %v1018_v35  ;;  %vm1035_vm14 = vweird.f32 %v2460_v36  ;;  %v2462_v14 = vpop.eup %2461  ;;  %v2288_v27 = vld [vmem:[#allocation11 + $0x8] sm:$0xff] }
 0x28c   : > { %v1027_v40 = vsel %vm1024_vm13, %v1026_v37, %v1022_v39  ;;  %vm1036_vm2 = vmor %vm1034_vm15, %vm1035_vm14  ;;  %v1140_v15 = vmul.f32 32.0, %v2462_v14  ;;  %vm1144_vm4 = vweird.f32 %v2462_v14  ;;  %1203 = vmatpush.bf16.msrb.mxu2 %v2288_v27  ;;  %vm1297_vm13 = vcmask 523264  }
 0x28d   : > { %v1031_v41 = vsub.f32 1.0, %v1030_v38  ;;  %v1028_v42 = vmul.f32 %v3112_v53, %v1027_v40  ;;  %v2427_v38 = vld [vmem:[#allocation10] ss:$0 sm:$0xff] }
 0x28e   : > { %v1141_v16 = vsub.f32 1.0, %v1140_v15 }
 0x28f   : > { %v1032_v44 = vmul.f32 %v2460_v36, %v1031_v41  ;;  %2139 = vmatmul.msk.f32.gmra.mxu0 %vm947_vm1, %v1028_v42  ;;  %v2428_v41 = vld [vmem:[%s3356_s12] ss:$0 sm:$0xff] }
 0x290   : > { %v1142_v17 = vmul.f32 %v2462_v14, %v1141_v16  ;;  %1204 = vmatpush.bf16.msrb.mxu2 %v2287_v28 }
 0x291   : > { %v1033_v46 = vadd.f32 %v2460_v36, %v1032_v44 }
 0x292   : > { %v1143_v19 = vadd.f32 %v2462_v14, %v1142_v17  ;;  %v2289_v17 = vld [vmem:[%s3418_s28] sm:$0xff] }
 0x293   : > { %v1037_v48 = vsel %vm1036_vm2, %v2460_v36, %v1033_v46 }
 0x294   : > { %v1042_v49 = vsel %vm1039_vm3, %v1041_v47, %v1037_v48  ;;  %v3143_v21 = vsel %vm1144_vm4, %v2462_v14, %v1143_v19  ;;  %v2290_v14 = vld [vmem:[%s3418_s28 + $0x8] sm:$0xff] }
 0x295   : > { %v1043_v50 = vmul.f32 %v3116_v56, %v1042_v49 }
 0x297   : > { %2140 = vmatmul.msk.f32.gmra.mxu0 %vm947_vm1, %v1043_v50 }
 0x2fc   : > { %v1073_v53 = vpop.f32.mrf.mxu0 }
 0x2fd   : > { %v1085_v58 = vmul.f32 %v3082_v10, %v1073_v53 }
 0x2ff   : > { %v1089_v61 = vsel %vm800_vm0, %v1085_v58, 0.0 }
 0x304   : > { %v1076_v54 = vpop.f32.mrf.mxu0 }
 0x305   : > { %v1086_v57 = vmul.f32 %v3087_v18, %v1076_v54 }
 0x307   : > { %v1090_v60 = vsel %vm800_vm0, %v1086_v57, 0.0 }
 0x308   : > { %v1091_v62 = vadd.f32 %v1090_v60, %v1089_v61 }
 0x30c   : > { %v1079_v55 = vpop.f32.mrf.mxu0 }
 0x30d   : > { %v1087_v59 = vmul.f32 %v3091_v20, %v1079_v55 }
 0x30f   : > { %v1092_v56 = vsel %vm800_vm0, %v1087_v59, 0.0 }
 0x310   : > { %v1093_v1 = vadd.f32 %v1092_v56, %v1091_v62 }
 0x314   : > { %v1082_v63 = vpop.f32.mrf.mxu0 }
 0x315   : > { %v1088_v0 = vmul.f32 %v3095_v22, %v1082_v63 }
 0x317   : > { %v1094_v2 = vsel %vm800_vm0, %v1088_v0, 0.0 }
 0x318   : > { %v1095_v3 = vadd.f32 %v1094_v2, %v1093_v1 }
 0x31a   : > { %v1096_v4 = vpack.c.bf16 %v1095_v3, %v1095_v3 }
 0x31c   : > { %2149 = vmatmul.msk.bf16.vlgmr.msrb.gmra.mxu1 %vm800_vm0, %v1096_v4 }
 0x399   : > { %v1129_v7 = vpop.f32.mrf.mxu1 }
 0x39a   : > { %v1130_v8 = vadd.f32 %v2426_v5, %v1129_v7  ;;  %v2292_v7 = vld [vmem:[%s3418_s28 + $0x18] sm:$0xff] }
 0x39b   : > { %1305 = vmatpush.bf16.msrb.mxu3 %v2292_v7 }
 0x39c   : > { %v1133_v9 = vadd.f32 %v1130_v8, %v3070_v6 }
 0x39e   : > { %v1136_v11 = vsel %vm800_vm0, %v1133_v9, 0.0 }
 0x39f   : > { %1137 = vadd.xlane.f32.xlu2 %v1136_v11  ;;  %v2291_v11 = vld [vmem:[%s3418_s28 + $0x10] sm:$0xff] }
 0x3a0   : > { %1306 = vmatpush.bf16.msrb.mxu3 %v2291_v11  ;;  %v2433_v11 = vld [vmem:[%s3413_s6 + $0x1] ss:$0 sm:$0xff]  ;;  %s3423_s6 = sld [smem:[#allocation39_spill]] }
 0x3a1   : > { %v1131_v12 = vpop.f32.mrf.mxu1 }
 0x3a4   : > { %1307 = vmatpush.bf16.msrb.mxu3 %v2290_v14 }
 0x3a8   : > { %1308 = vmatpush.bf16.msrb.mxu3 %v2289_v17 }
 0x412   : > { %v1138_v23 = vpop.xlane.xlu2 %1137 }
 0x413   : > { %v1146_v24 = vmul.f32 %v3143_v21, %v1138_v23 }
 0x415   : > { %v1147_v25 = vsub.f32 %v1133_v9, %v1146_v24 }
 0x417   : > { %v1148_v26 = vmul.f32 %v1147_v25, %v1147_v25 }
 0x419   : > { %v1149_v6 = vsel %vm800_vm0, %v1148_v26, 0.0 }
 0x41a   : > { %1150 = vadd.xlane.f32.xlu0 %v1149_v6 }
 0x48d   : > { %v1151_v29 = vpop.xlane.xlu0 %1150 }
 0x48e   : > { %v1152_v30 = vmul.f32 %v1151_v29, %v3143_v21 }
 0x490   : > { %v1153_v31 = vadd.f32 1e-05, %v1152_v30 }
 0x492   : > { %2463 = vrsqrt.f32 %v1153_v31  ;;  %vm1160_vm6 = vweird.f32 %v1153_v31 }
 0x498   : > { %v2464_v32 = vpop.eup %2463 }
 0x499   : > { %v1155_v33 = vmul.f32 %v2464_v32, %v1153_v31  ;;  %vm1161_vm5 = vweird.f32 %v2464_v32 }
 0x49a   : > { %vm1162_vm7 = vmor %vm1160_vm6, %vm1161_vm5 }
 0x49b   : > { %v1156_v34 = vmul.f32 %v2464_v32, %v1155_v33 }
 0x49d   : > { %v1157_v35 = vmul.f32 0.5, %v1156_v34 }
 0x49f   : > { %v1158_v36 = vsub.f32 1.5, %v1157_v35 }
 0x4a1   : > { %v1159_v37 = vmul.f32 %v2464_v32, %v1158_v36 }
 0x4a3   : > { %v1163_v39 = vsel %vm1162_vm7, %v2464_v32, %v1159_v37 }
 0x4a4   : > { %v1164_v40 = vmul.f32 %v1163_v39, %v1147_v25  ;;  %v2430_v39 = vld [vmem:[%s3419_s13] ss:$0 sm:$0xff] }
 0x4a6   : > { %v1168_v42 = vmul.f32 %v2427_v38, %v1164_v40 }
 0x4a8   : > { %v3151_v43 = vadd.f32 %v2428_v41, %v1168_v42 }
 0x4aa   : > { %v1173_v44 = vpack.c.bf16 %v3151_v43, %v3151_v43 }
 0x4ac   : > { %2158 = vmatmul.msk.bf16.vlgmr.msrb.gmra.mxu2 %vm800_vm0, %v1173_v44 }
 0x52f   : > { %v1206_v46 = vpop.f32.mrf.mxu2 }
 0x530   : > { %v1207_v47 = vadd.f32 %v2429_v45, %v1206_v46 }
 0x532   : > { %v1211_v48 = vmul.f32 0.70710677, %v1207_v47  ;;  %v1210_v35 = vmul.f32 0.5, %v1207_v47 }
 0x534   : > { %v1212_v49 = vand.u32 2147483647, %v1211_v48  ;;  %vm1254_vm12 = vcmp.ge.f32.partialorder %v1211_v48, 0.0 }
 0x536   : > { %v1213_v50 = vmul.f32 0.5, %v1212_v49  ;;  %v1248_v25 = vsub.f32 0.0, %v1212_v49 }
 0x537   : > { %v1208_v51 = vpop.f32.mrf.mxu2 }
 0x538   : > { %v1214_v52 = vadd.f32 1.0, %v1213_v50  ;;  %v1249_v27 = vmul.f32 %v1248_v25, %v1212_v49  ;;  %v2294_v51 = vld [vmem:[%s3411_s30 + $0x18] sm:$0xff] }
 0x539   : > { %1379 = vmatpush.bf16.msra.mxu1 %v2294_v51 }
 0x53a   : > { %2465 = vrcp.f32 %v1214_v52  ;;  %v1226_v57 = vand.u32 2147483648, %v1214_v52  ;;  %v1224_v59 = vand.u32 2147483647, %v1214_v52  ;;  %vm1220_vm9 = vweird.f32 %v1214_v52 }
 0x53c   : > { %v1227_v61 = vor.u32 1.1754944e-38, %v1226_v57  ;;  %vm1225_vm11 = vcmp.eq.f32.partialorder %v1224_v59, 8.507059e+37 }
 0x540   : > { %v2466_v53 = vpop.eup %2465 }
 0x541   : > { %v1216_v54 = vmul.f32 %v2466_v53, %v1214_v52  ;;  %vm1221_vm8 = vweird.f32 %v2466_v53  ;;  %v2298_v52 = vld [vmem:[%s3415_s23 + $0x18] sm:$0xff] }
 0x542   : > { %vm1222_vm10 = vmor %vm1220_vm9, %vm1221_vm8  ;;  %1449 = vmatpush.bf16.msra.mxu3 %v2298_v52 }
 0x543   : > { %v1217_v55 = vsub.f32 1.0, %v1216_v54  ;;  %v2295_v54 = vld [vmem:[%s3412_s21 + $0x10] sm:$0xff] }
 0x545   : > { %v1218_v58 = vmul.f32 %v2466_v53, %v1217_v55  ;;  %v2297_v55 = vld [vmem:[%s3415_s23 + $0x10] sm:$0xff] }
 0x546   : > { %1450 = vmatpush.bf16.msra.mxu3 %v2297_v55 }
 0x547   : > { %v1219_v60 = vadd.f32 %v2466_v53, %v1218_v58 }
 0x549   : > { %v1223_v56 = vsel %vm1222_vm10, %v2466_v53, %v1219_v60  ;;  %v2293_v53 = vld [vmem:[%s3411_s30 + $0x10] sm:$0xff] }
 0x54a   : > { %v1228_v62 = vsel %vm1225_vm11, %v1227_v61, %v1223_v56  ;;  %1380 = vmatpush.bf16.msra.mxu1 %v2293_v53 }
 0x54b   : > { %v1230_v63 = vmul.f32 0.17087276, %v1228_v62 }
 0x54d   : > { %v1231_v0 = vadd.f32 -0.82215226, %v1230_v63 }
 0x54f   : > { %v1232_v1 = vmul.f32 %v1231_v0, %v1228_v62 }
 0x551   : > { %v1233_v2 = vadd.f32 1.4885159, %v1232_v1  ;;  %v2431_v1 = vld [vmem:[#allocation13] ss:$0 sm:$0xff] }
 0x553   : > { %v1234_v3 = vmul.f32 %v1233_v2, %v1228_v62 }
 0x555   : > { %v1235_v4 = vadd.f32 -1.135204, %v1234_v3  ;;  %v2432_v3 = vld [vmem:[%s3420_s19] ss:$0 sm:$0xff] }
 0x557   : > { %v1236_v5 = vmul.f32 %v1235_v4, %v1228_v62 }
 0x559   : > { %v1237_v8 = vadd.f32 0.27886808, %v1236_v5 }
 0x55b   : > { %v1238_v9 = vmul.f32 %v1237_v8, %v1228_v62 }
 0x55d   : > { %v1239_v12 = vadd.f32 -0.18628806, %v1238_v9 }
 0x55f   : > { %v1240_v13 = vmul.f32 %v1239_v12, %v1228_v62  ;;  %v2434_v12 = vld [vmem:[%s3414_s7 + $0x1] ss:$0 sm:$0xff]  ;;  %s770_s7 = scalar_lea.vmem [#allocation14], %s3424_s4 }
 0x561   : > { %v1241_v15 = vadd.f32 0.09678418, %v1240_v13  ;;  %v2435_v13 = vld [vmem:[%s3416_s8 + $0x1] ss:$0 sm:$0xff]  ;;  %s1955_s8 = sshll.u32 %s770_s7, 4  ;;  %s1956_s8 = int_to_ptr.vmem [resolvable:$true] %s1955_s8 }
 0x563   : > { %v1242_v16 = vmul.f32 %v1241_v15, %v1228_v62 }
 0x565   : > { %v1243_v19 = vadd.f32 0.37409195, %v1242_v16 }
 0x567   : > { %v1244_v23 = vmul.f32 %v1243_v19, %v1228_v62 }
 0x569   : > { %v1245_v24 = vadd.f32 1.0000237, %v1244_v23 }
 0x56b   : > { %v1246_v26 = vmul.f32 %v1245_v24, %v1228_v62 }
 0x56d   : > { %v1247_v6 = vadd.f32 -1.2655122, %v1246_v26 }
 0x56f   : > { %v1250_v28 = vadd.f32 %v1249_v27, %v1247_v6 }
 0x571   : > { %v1251_v29 = vmul.f32 1.442695, %v1250_v28 }
 0x573   : > { %2467 = vpow2.f32 %v1251_v29 }
 0x579   : > { %v2468_v30 = vpop.eup %2467 }
 0x57a   : > { %v1253_v31 = vmul.f32 %v2468_v30, %v1228_v62 }
 0x57c   : > { %v1255_v32 = vsub.f32 2.0, %v1253_v31 }
 0x57e   : > { %v1256_v33 = vsel %vm1254_vm12, %v1253_v31, %v1255_v32 }
 0x57f   : > { %v1257_v34 = vsub.f32 1.0, %v1256_v33 }
 0x581   : > { %v1258_v36 = vadd.f32 1.0, %v1257_v34 }
 0x583   : > { %v1259_v37 = vmul.f32 %v1258_v36, %v1210_v35 }
 0x585   : > { %v1260_v38 = vpack.c.bf16 %v1259_v37, %v1259_v37 }
 0x587   : > { %2175 = vmatmul.msk.bf16.vlgmr.msrb.gmra.mxu3 %vm1297_vm13, %v1260_v38 }
 0x60a   : > { %v1310_v40 = vpop.f32.mrf.mxu3 }
 0x60b   : > { %v1311_v41 = vadd.f32 %v2430_v39, %v1310_v40 }
 0x60d   : > { %v1314_v42 = vadd.f32 %v1311_v41, %v3151_v43  ;;  %v2296_v43 = vld [vmem:[%s3412_s21 + $0x18] sm:$0xff] }
 0x60e   : > { %1414 = vmatpush.bf16.msra.mxu2 %v2296_v43 }
 0x60f   : > { %v1317_v44 = vsel %vm800_vm0, %v1314_v42, 0.0 }
 0x610   : > { %1318 = vadd.xlane.f32.xlu1 %v1317_v44 }
 0x612   : > { %v1312_v45 = vpop.f32.mrf.mxu3  ;;  %1415 = vmatpush.bf16.msra.mxu2 %v2295_v54 }
 0x683   : > { %v1319_v46 = vpop.xlane.xlu1 %1318 }
 0x684   : > { %v1320_v47 = vmul.f32 %v1319_v46, %v3143_v21 }
 0x686   : > { %v1321_v48 = vsub.f32 %v1314_v42, %v1320_v47 }
 0x688   : > { %v1322_v49 = vmul.f32 %v1321_v48, %v1321_v48 }
 0x68a   : > { %v1323_v50 = vsel %vm800_vm0, %v1322_v49, 0.0 }
 0x68b   : > { %1324 = vadd.xlane.f32.xlu2 %v1323_v50 }
 0x6fe   : > { %v1325_v57 = vpop.xlane.xlu2 %1324 }
 0x6ff   : > { %v1326_v58 = vmul.f32 %v1325_v57, %v3143_v21 }
 0x701   : > { %v1327_v59 = vadd.f32 1e-05, %v1326_v58 }
 0x703   : > { %2469 = vrsqrt.f32 %v1327_v59  ;;  %vm1334_vm15 = vweird.f32 %v1327_v59 }
 0x709   : > { %v2470_v60 = vpop.eup %2469 }
 0x70a   : > { %v1329_v61 = vmul.f32 %v2470_v60, %v1327_v59  ;;  %vm1335_vm14 = vweird.f32 %v2470_v60 }
 0x70b   : > { %vm1336_vm2 = vmor %vm1334_vm15, %vm1335_vm14 }
 0x70c   : > { %v1330_v56 = vmul.f32 %v2470_v60, %v1329_v61 }
 0x70e   : > { %v1331_v62 = vmul.f32 0.5, %v1330_v56 }
 0x710   : > { %v1332_v63 = vsub.f32 1.5, %v1331_v62 }
 0x712   : > { %v1333_v0 = vmul.f32 %v2470_v60, %v1332_v63 }
 0x714   : > { %v1337_v2 = vsel %vm1336_vm2, %v2470_v60, %v1333_v0 }
 0x715   : > { %v1338_v4 = vmul.f32 %v1337_v2, %v1321_v48 }
 0x717   : > { %v1342_v5 = vmul.f32 %v2431_v1, %v1338_v4 }
 0x719   : > { %v3201_v7 = vadd.f32 %v2432_v3, %v1342_v5 }
 0x71b   : > { %v1347_v8 = vpack.c.bf16 %v3201_v7, %v3201_v7 }
 0x71d   : > { %2189 = vmatmul.msk.bf16.vlgmr.msra.gmra.mxu1 %vm800_vm0, %v1347_v8  ;;  %2203 = vmatmul.msk.bf16.vlgmr.msra.gmra.mxu2 %vm800_vm0, %v1347_v8 }
 0x71e   : > { %2217 = vmatmul.msk.bf16.vlgmr.msra.gmra.mxu3 %vm800_vm0, %v1347_v8 }
 0x79a   : > { %v1382_v9 = vpop.f32.mrf.mxu1 }
 0x79b   : > { %v1383_v14 = vadd.f32 %v2433_v11, %v1382_v9 }
 0x79d   : > { %v1456_v24 = vmul.f32 %v3082_v10, %v1383_v14  ;;  %v1457_v6 = vmul.f32 %v3087_v18, %v1383_v14  ;;  %v1458_v27 = vmul.f32 %v3091_v20, %v1383_v14  ;;  %v1459_v28 = vmul.f32 %v3095_v22, %v1383_v14 }
 0x7a0   : > { %v1417_v15 = vpop.f32.mrf.mxu2 }
 0x7a1   : > { %v1418_v16 = vadd.f32 %v2434_v12, %v1417_v15  ;;  %v1452_v17 = vpop.f32.mrf.mxu3 }
 0x7a2   : > { %v1453_v19 = vadd.f32 %v2435_v13, %v1452_v17  ;;  %v1384_v23 = vpop.f32.mrf.mxu1 }
 0x7a3   : > { %2218 = vmatpush.xpose.msk.msra.mxu0 %vm800_vm0, %v1418_v16 }
 0x7a4   : > { %1631 = vmatpush.msrb.mxu1 %v1453_v19 }
 0x7a6   : > { %2219 = vmatmul.msk.f32.vlgmr.msra.gmra.mxu0 %vm800_vm0, %v1456_v24 }
 0x7a8   : > { %v1419_v25 = vpop.f32.mrf.mxu2 }
 0x7a9   : > { %v1454_v26 = vpop.f32.mrf.mxu3 }
 0x7ae   : > { %2220 = vmatmul.msk.f32.gmra.mxu0 %vm800_vm0, %v1457_v6 }
 0x7b6   : > { %2221 = vmatmul.msk.f32.gmra.mxu0 %vm800_vm0, %v1458_v27 }
 0x7be   : > { %2222 = vmatmul.msk.f32.gmra.mxu0 %vm800_vm0, %v1459_v28 }
 0x823   : > { %v1492_v29 = vpop.f32.mrf.mxu0 }
 0x824   : > { %v1504_v30 = vmul.f32 0.35355338, %v1492_v29 }
 0x826   : > { %v1508_v31 = vsel %vm947_vm1, %v1504_v30, -inf }
 0x827   : > { %1509 = vmax.xlane.f32.xlu0 %v1508_v31 }
 0x82b   : > { %v1495_v32 = vpop.f32.mrf.mxu0 }
 0x82c   : > { %v1505_v33 = vmul.f32 0.35355338, %v1495_v32 }
 0x82e   : > { %v1511_v34 = vsel %vm947_vm1, %v1505_v33, -inf }
 0x82f   : > { %1512 = vmax.xlane.f32.xlu1 %v1511_v34 }
 0x833   : > { %v1498_v35 = vpop.f32.mrf.mxu0 }
 0x834   : > { %v1506_v36 = vmul.f32 0.35355338, %v1498_v35 }
 0x836   : > { %v1514_v37 = vsel %vm947_vm1, %v1506_v36, -inf }
 0x837   : > { %1515 = vmax.xlane.f32.xlu2 %v1514_v37 }
 0x83b   : > { %v1501_v38 = vpop.f32.mrf.mxu0 }
 0x83c   : > { %v1507_v39 = vmul.f32 0.35355338, %v1501_v38 }
 0x83e   : > { %v1517_v40 = vsel %vm947_vm1, %v1507_v39, -inf }
 0x83f   : > { %1518 = vmax.xlane.f32.xlu0 %v1517_v40 }
 0x89a   : > { %v1510_v41 = vpop.xlane.xlu0 %1509 }
 0x89b   : > { %v1520_v42 = vsub.f32 %v1504_v30, %v1510_v41 }
 0x89d   : > { %v1524_v44 = vmul.f32 1.442695, %v1520_v42 }
 0x89f   : > { %2471 = vpow2.f32 %v1524_v44 }
 0x8a2   : > { %v1513_v45 = vpop.xlane.xlu1 %1512 }
 0x8a3   : > { %v1521_v46 = vsub.f32 %v1505_v33, %v1513_v45 }
 0x8a5   : > { %v2472_v47 = vpop.eup %2471  ;;  %v1526_v48 = vmul.f32 1.442695, %v1521_v46 }
 0x8a6   : > { %v1532_v49 = vsel %vm947_vm1, %v2472_v47, 0.0 }
 0x8a7   : > { %2473 = vpow2.f32 %v1526_v48  ;;  %1533 = vadd.xlane.f32.xlu1 %v1532_v49 }
 0x8aa   : > { %v1516_v50 = vpop.xlane.xlu2 %1515 }
 0x8ab   : > { %v1522_v51 = vsub.f32 %v1506_v36, %v1516_v50 }
 0x8ad   : > { %v2474_v43 = vpop.eup %2473  ;;  %v1528_v52 = vmul.f32 1.442695, %v1522_v51 }
 0x8ae   : > { %v1535_v53 = vsel %vm947_vm1, %v2474_v43, 0.0 }
 0x8af   : > { %2475 = vpow2.f32 %v1528_v52  ;;  %1536 = vadd.xlane.f32.xlu2 %v1535_v53  ;;  %v2299_v52 = vld [vmem:[#allocation8 + $0x10] sm:$0xff] }
 0x8b2   : > { %v1519_v54 = vpop.xlane.xlu0 %1518 }
 0x8b3   : > { %v1523_v55 = vsub.f32 %v1507_v39, %v1519_v54 }
 0x8b5   : > { %v3232_v57 = vpop.eup %2475  ;;  %v1530_v58 = vmul.f32 1.442695, %v1523_v55 }
 0x8b6   : > { %v1538_v59 = vsel %vm947_vm1, %v3232_v57, 0.0 }
 0x8b7   : > { %2477 = vpow2.f32 %v1530_v58  ;;  %1539 = vadd.xlane.f32.xlu0 %v1538_v59 }
 0x8bd   : > { %v3236_v60 = vpop.eup %2477 }
 0x8be   : > { %v1541_v61 = vsel %vm947_vm1, %v3236_v60, 0.0 }
 0x8bf   : > { %1542 = vadd.xlane.f32.xlu1 %v1541_v61 }
 0x91a   : > { %v1534_v56 = vpop.xlane.xlu1 %1533 }
 0x91b   : > { %2479 = vrcp.f32 %v1534_v56  ;;  %v1555_v2 = vand.u32 2147483648, %v1534_v56  ;;  %v1553_v4 = vand.u32 2147483647, %v1534_v56  ;;  %vm1549_vm4 = vweird.f32 %v1534_v56 }
 0x91d   : > { %v1556_v9 = vor.u32 1.1754944e-38, %v1555_v2  ;;  %vm1554_vm6 = vcmp.eq.f32.partialorder %v1553_v4, 8.507059e+37 }
 0x921   : > { %v2480_v62 = vpop.eup %2479 }
 0x922   : > { %v1545_v63 = vmul.f32 %v2480_v62, %v1534_v56  ;;  %v1537_v0 = vpop.xlane.xlu2 %1536  ;;  %vm1550_vm3 = vweird.f32 %v2480_v62 }
 0x923   : > { %2481 = vrcp.f32 %v1537_v0  ;;  %vm1551_vm5 = vmor %vm1549_vm4, %vm1550_vm3  ;;  %v1570_v17 = vand.u32 2147483648, %v1537_v0  ;;  %v1568_v23 = vand.u32 2147483647, %v1537_v0  ;;  %vm1564_vm8 = vweird.f32 %v1537_v0 }
 0x924   : > { %v1546_v1 = vsub.f32 1.0, %v1545_v63 }
 0x925   : > { %v1571_v26 = vor.u32 1.1754944e-38, %v1570_v17  ;;  %vm1569_vm10 = vcmp.eq.f32.partialorder %v1568_v23, 8.507059e+37 }
 0x926   : > { %v1547_v3 = vmul.f32 %v2480_v62, %v1546_v1 }
 0x928   : > { %v1548_v5 = vadd.f32 %v2480_v62, %v1547_v3 }
 0x929   : > { %v2482_v8 = vpop.eup %2481 }
 0x92a   : > { %v1552_v11 = vsel %vm1551_vm5, %v2480_v62, %v1548_v5  ;;  %v1560_v12 = vmul.f32 %v2482_v8, %v1537_v0  ;;  %v1540_v13 = vpop.xlane.xlu0 %1539  ;;  %vm1565_vm7 = vweird.f32 %v2482_v8 }
 0x92b   : > { %v1557_v14 = vsel %vm1554_vm6, %v1556_v9, %v1552_v11  ;;  %2483 = vrcp.f32 %v1540_v13  ;;  %vm1566_vm9 = vmor %vm1564_vm8, %vm1565_vm7  ;;  %v1585_v32 = vand.u32 2147483648, %v1540_v13  ;;  %v1583_v34 = vand.u32 2147483647, %v1540_v13 }
 0x92c   : > { %v1561_v15 = vsub.f32 1.0, %v1560_v12  ;;  %v1558_v16 = vmul.f32 %v2472_v47, %v1557_v14  ;;  %vm1579_vm12 = vweird.f32 %v1540_v13 }
 0x92d   : > { %v1586_v37 = vor.u32 1.1754944e-38, %v1585_v32  ;;  %vm1584_vm15 = vcmp.eq.f32.partialorder %v1583_v34, 8.507059e+37 }
 0x92e   : > { %v1562_v19 = vmul.f32 %v2482_v8, %v1561_v15  ;;  %2223 = vmatmul.msk.f32.vlgmr.msrb.gmra.mxu1 %vm947_vm1, %v1558_v16  ;;  %v2302_v15 = vld [vmem:[#allocation11 + $0x18] sm:$0xff]  ;;  %v2301_v16 = vld [vmem:[#allocation11 + $0x10] sm:$0xff] }
 0x92f   : > { %1762 = vmatpush.bf16.msrb.mxu3 %v2302_v15 }
 0x930   : > { %v1563_v24 = vadd.f32 %v2482_v8, %v1562_v19 }
 0x931   : > { %v2484_v25 = vpop.eup %2483 }
 0x932   : > { %v1575_v6 = vmul.f32 %v2484_v25, %v1540_v13  ;;  %v1543_v27 = vpop.xlane.xlu1 %1542  ;;  %v1567_v28 = vsel %vm1566_vm9, %v2482_v8, %v1563_v24  ;;  %vm1580_vm11 = vweird.f32 %v2484_v25 }
 0x933   : > { %2485 = vrcp.f32 %v1543_v27  ;;  %v1572_v29 = vsel %vm1569_vm10, %v1571_v26, %v1567_v28  ;;  %vm1581_vm14 = vmor %vm1579_vm12, %vm1580_vm11  ;;  %v1600_v44 = vand.u32 2147483648, %v1543_v27  ;;  %v1598_v46 = vand.u32 2147483647, %v1543_v27  ;;  %1763 = vmatpush.bf16.msrb.mxu3 %v2301_v16  ;;  %v2437_v28 = vld [vmem:[#allocation10 + $0x1] ss:$0 sm:$0xff] }
 0x934   : > { %v1576_v30 = vsub.f32 1.0, %v1575_v6  ;;  %v1573_v31 = vmul.f32 %v2474_v43, %v1572_v29  ;;  %vm1594_vm3 = vweird.f32 %v1543_v27  ;;  %v2300_v43 = vld [vmem:[#allocation8 + $0x18] sm:$0xff] }
 0x935   : > { %v1601_v48 = vor.u32 1.1754944e-38, %v1600_v44  ;;  %vm1599_vm5 = vcmp.eq.f32.partialorder %v1598_v46, 8.507059e+37  ;;  %1688 = vmatpush.bf16.msrb.mxu2 %v2300_v43 }
 0x936   : > { %v1577_v33 = vmul.f32 %v2484_v25, %v1576_v30  ;;  %2224 = vmatmul.msk.f32.gmra.mxu1 %vm947_vm1, %v1573_v31  ;;  %v2438_v30 = vld [vmem:[%s3356_s12 + $0x1] ss:$0 sm:$0xff] }
 0x938   : > { %v1578_v35 = vadd.f32 %v2484_v25, %v1577_v33 }
 0x939   : > { %v2486_v36 = vpop.eup %2485  ;;  %1689 = vmatpush.bf16.msrb.mxu2 %v2299_v52 }
 0x93a   : > { %v1590_v38 = vmul.f32 %v2486_v36, %v1543_v27  ;;  %v1582_v39 = vsel %vm1581_vm14, %v2484_v25, %v1578_v35  ;;  %vm1595_vm2 = vweird.f32 %v2486_v36  ;;  %v2439_v35 = vld [vmem:[%s3358_s14 + $0x1] ss:$0 sm:$0xff] }
 0x93b   : > { %v1587_v40 = vsel %vm1584_vm15, %v1586_v37, %v1582_v39  ;;  %vm1596_vm4 = vmor %vm1594_vm3, %vm1595_vm2 }
 0x93c   : > { %v1591_v41 = vsub.f32 1.0, %v1590_v38  ;;  %v1588_v42 = vmul.f32 %v3232_v57, %v1587_v40 }
 0x93e   : > { %v1592_v45 = vmul.f32 %v2486_v36, %v1591_v41  ;;  %2225 = vmatmul.msk.f32.gmra.mxu1 %vm947_vm1, %v1588_v42 }
 0x940   : > { %v1593_v47 = vadd.f32 %v2486_v36, %v1592_v45 }
 0x942   : > { %v1597_v49 = vsel %vm1596_vm4, %v2486_v36, %v1593_v47 }
 0x943   : > { %v1602_v50 = vsel %vm1599_vm5, %v1601_v48, %v1597_v49 }
 0x944   : > { %v1603_v51 = vmul.f32 %v3236_v60, %v1602_v50 }
 0x946   : > { %2226 = vmatmul.msk.f32.gmra.mxu1 %vm947_vm1, %v1603_v51 }
 0x9ab   : > { %v1633_v53 = vpop.f32.mrf.mxu1 }
 0x9ac   : > { %v1645_v58 = vmul.f32 %v3082_v10, %v1633_v53  ;;  %v2436_v10 = vld [vmem:[%s3417_s10 + $0x1] ss:$0 sm:$0xff]  ;;  %s1957_s10 = sshll.u32 %s1953_s11, 4  ;;  %s1958_s10 = int_to_ptr.hbm [resolvable:$true] %s1957_s10 }
 0x9ad   : > { %s2721_s18 = sshra.s32 %s1958_s10, 4  ;;  %s2722_s18 = int_to_ptr.hbm [resolvable:$true] %s2721_s18 }
 0x9ae   : > { %v1649_v56 = vsel %vm800_vm0, %v1645_v58, 0.0  ;;  %s2723_s15 = scalar_lea.hbm %s2722_s18, 8  ;;  %p2728_p12 = scmp.lt.s32.totalorder %s2722_s18, %s3422_s17 }
 0x9af   : > { %p2724_p1 = scmp.ne.s32.totalorder %s2722_s18, %s2723_s15 }
 0x9b1   : > { %p2725_p3 = pnand %p2724_p1, %p3005_p5 }
 0x9b3   : > { %v1636_v54 = vpop.f32.mrf.mxu1  ;;  %p2726_p4 = pneg %p2725_p3 }
 0x9b4   : > { %v1646_v57 = vmul.f32 %v3087_v18, %v1636_v54 }
 0x9b6   : > { %v1650_v61 = vsel %vm800_vm0, %v1646_v57, 0.0 }
 0x9b7   : > { %v1651_v62 = vadd.f32 %v1650_v61, %v1649_v56  ;;  %v2306_v56 = vld [vmem:[%s3418_s28 + $0x38] sm:$0xff] }
 0x9b8   : > { %1865 = vmatpush.bf16.msra.mxu2 %v2306_v56 }
 0x9bb   : > { %v1639_v55 = vpop.f32.mrf.mxu1 }
 0x9bc   : > { %v1647_v59 = vmul.f32 %v3091_v20, %v1639_v55 }
 0x9be   : > { %v1652_v60 = vsel %vm800_vm0, %v1647_v59, 0.0 }
 0x9bf   : > { %v1653_v1 = vadd.f32 %v1652_v60, %v1651_v62 }
 0x9c3   : > { %v1642_v63 = vpop.f32.mrf.mxu1 }
 0x9c4   : > { %v1648_v0 = vmul.f32 %v3095_v22, %v1642_v63  ;;  %v2305_v63 = vld [vmem:[%s3418_s28 + $0x30] sm:$0xff] }
 0x9c5   : > { %1866 = vmatpush.bf16.msra.mxu2 %v2305_v63 }
 0x9c6   : > { %v1654_v2 = vsel %vm800_vm0, %v1648_v0, 0.0 }
 0x9c7   : > { %v1655_v3 = vadd.f32 %v1654_v2, %v1653_v1  ;;  %v2304_v2 = vld [vmem:[%s3418_s28 + $0x28] sm:$0xff] }
 0x9c9   : > { %v1656_v4 = vpack.c.bf16 %v1655_v3, %v1655_v3  ;;  %1867 = vmatpush.bf16.msra.mxu2 %v2304_v2  ;;  %v2443_v2 = vld [vmem:[%s3421_s20] ss:$0 sm:$0xff]  ;;  %s2727_s20 = scalar_lea.hbm %s3422_s17, 16 }
 0x9ca   : > { %p2729_p7 = scmp.lt.s32.totalorder %s2727_s20, %s2723_s15 }
 0x9cb   : > { %2236 = vmatmul.msk.bf16.vlgmr.msrb.gmra.mxu2 %vm800_vm0, %v1656_v4 }
 0x9cc   : > { %p2730_p8 = por %p2729_p7, %p2728_p12 }
 0x9ce   : > { %p2731_p9 = pnand %p2730_p8, %p2726_p4 }
 0xa4e   : > { %v1691_v18 = vpop.f32.mrf.mxu2 }
 0xa4f   : > { %v1692_v20 = vadd.f32 %v2436_v10, %v1691_v18  ;;  %v2303_v10 = vld [vmem:[%s3418_s28 + $0x20] sm:$0xff] }
 0xa50   : > { %1868 = vmatpush.bf16.msra.mxu2 %v2303_v10 }
 0xa51   : > { %v1695_v5 = vadd.f32 %v1692_v20, %v3201_v7 }
 0xa53   : > { %v1700_v8 = vsel %vm800_vm0, %v1695_v5, 0.0 }
 0xa54   : > { %1701 = vadd.xlane.f32.xlu2 %v1700_v8 }
 0xa56   : > { %v1693_v9 = vpop.f32.mrf.mxu2 }
 0xac7   : > { %v1702_v22 = vpop.xlane.xlu2 %1701 }
 0xac8   : > { %v1703_v11 = vmul.f32 %v1702_v22, %v3143_v21 }
 0xaca   : > { %v1704_v12 = vsub.f32 %v1695_v5, %v1703_v11 }
 0xacc   : > { %v1705_v13 = vmul.f32 %v1704_v12, %v1704_v12 }
 0xace   : > { %v1706_v14 = vsel %vm800_vm0, %v1705_v13, 0.0 }
 0xacf   : > { %1707 = vadd.xlane.f32.xlu0 %v1706_v14 }
 0xb42   : > { %v1708_v17 = vpop.xlane.xlu0 %1707 }
 0xb43   : > { %v1709_v19 = vmul.f32 %v1708_v17, %v3143_v21 }
 0xb45   : > { %v1710_v7 = vadd.f32 1e-05, %v1709_v19 }
 0xb47   : > { %2487 = vrsqrt.f32 %v1710_v7  ;;  %vm1717_vm6 = vweird.f32 %v1710_v7 }
 0xb4d   : > { %v2488_v23 = vpop.eup %2487 }
 0xb4e   : > { %v1712_v24 = vmul.f32 %v2488_v23, %v1710_v7  ;;  %vm1718_vm1 = vweird.f32 %v2488_v23 }
 0xb4f   : > { %vm1719_vm7 = vmor %vm1717_vm6, %vm1718_vm1 }
 0xb50   : > { %v1713_v25 = vmul.f32 %v2488_v23, %v1712_v24 }
 0xb52   : > { %v1714_v26 = vmul.f32 0.5, %v1713_v25 }
 0xb54   : > { %v1715_v6 = vsub.f32 1.5, %v1714_v26  ;;  %v2440_v26 = vld [vmem:[%s3419_s13 + $0x1] ss:$0 sm:$0xff] }
 0xb56   : > { %v1716_v27 = vmul.f32 %v2488_v23, %v1715_v6 }
 0xb58   : > { %v1720_v29 = vsel %vm1719_vm7, %v2488_v23, %v1716_v27 }
 0xb59   : > { %v1721_v31 = vmul.f32 %v1720_v29, %v1704_v12 }
 0xb5b   : > { %v1725_v32 = vmul.f32 %v2437_v28, %v1721_v31 }
 0xb5d   : > { %v3266_v33 = vadd.f32 %v2438_v30, %v1725_v32 }
 0xb5f   : > { %v1730_v34 = vpack.c.bf16 %v3266_v33, %v3266_v33 }
 0xb61   : > { %2247 = vmatmul.msk.bf16.vlgmr.msrb.gmra.mxu3 %vm800_vm0, %v1730_v34 }
 0xbe4   : > { %v1765_v36 = vpop.f32.mrf.mxu3 }
 0xbe5   : > { %v1766_v37 = vadd.f32 %v2439_v35, %v1765_v36 }
 0xbe7   : > { %v1770_v38 = vmul.f32 0.70710677, %v1766_v37  ;;  %v1769_v7 = vmul.f32 0.5, %v1766_v37 }
 0xbe9   : > { %v1771_v39 = vand.u32 2147483647, %v1770_v38  ;;  %vm1813_vm12 = vcmp.ge.f32.partialorder %v1770_v38, 0.0 }
 0xbeb   : > { %v1772_v40 = vmul.f32 0.5, %v1771_v39  ;;  %v1807_v8 = vsub.f32 0.0, %v1771_v39 }
 0xbec   : > { %v1767_v41 = vpop.f32.mrf.mxu3 }
 0xbed   : > { %v1773_v42 = vadd.f32 1.0, %v1772_v40  ;;  %v1808_v11 = vmul.f32 %v1807_v8, %v1771_v39 }
 0xbef   : > { %2489 = vrcp.f32 %v1773_v42  ;;  %v1785_v47 = vand.u32 2147483648, %v1773_v42  ;;  %v1783_v49 = vand.u32 2147483647, %v1773_v42  ;;  %vm1779_vm9 = vweird.f32 %v1773_v42 }
 0xbf1   : > { %v1786_v51 = vor.u32 1.1754944e-38, %v1785_v47  ;;  %vm1784_vm11 = vcmp.eq.f32.partialorder %v1783_v49, 8.507059e+37  ;;  %v2442_v49 = vld [vmem:[%s3420_s19 + $0x1] ss:$0 sm:$0xff] }
 0xbf5   : > { %v2490_v44 = vpop.eup %2489 }
 0xbf6   : > { %v1775_v45 = vmul.f32 %v2490_v44, %v1773_v42  ;;  %vm1780_vm8 = vweird.f32 %v2490_v44 }
 0xbf7   : > { %vm1781_vm10 = vmor %vm1779_vm9, %vm1780_vm8 }
 0xbf8   : > { %v1776_v46 = vsub.f32 1.0, %v1775_v45 }
 0xbfa   : > { %v1777_v48 = vmul.f32 %v2490_v44, %v1776_v46  ;;  %v2441_v46 = vld [vmem:[#allocation13 + $0x1] ss:$0 sm:$0xff] }
 0xbfc   : > { %v1778_v50 = vadd.f32 %v2490_v44, %v1777_v48 }
 0xbfe   : > { %v1782_v43 = vsel %vm1781_vm10, %v2490_v44, %v1778_v50 }
 0xbff   : > { %v1787_v52 = vsel %vm1784_vm11, %v1786_v51, %v1782_v43 }
 0xc00   : > { %v1789_v53 = vmul.f32 0.17087276, %v1787_v52 }
 0xc02   : > { %v1790_v54 = vadd.f32 -0.82215226, %v1789_v53 }
 0xc04   : > { %v1791_v55 = vmul.f32 %v1790_v54, %v1787_v52 }
 0xc06   : > { %v1792_v57 = vadd.f32 1.4885159, %v1791_v55 }
 0xc08   : > { %v1793_v58 = vmul.f32 %v1792_v57, %v1787_v52 }
 0xc0a   : > { %v1794_v59 = vadd.f32 -1.135204, %v1793_v58 }
 0xc0c   : > { %v1795_v61 = vmul.f32 %v1794_v59, %v1787_v52 }
 0xc0e   : > { %v1796_v60 = vadd.f32 0.27886808, %v1795_v61 }
 0xc10   : > { %v1797_v62 = vmul.f32 %v1796_v60, %v1787_v52 }
 0xc12   : > { %v1798_v0 = vadd.f32 -0.18628806, %v1797_v62 }
 0xc14   : > { %v1799_v1 = vmul.f32 %v1798_v0, %v1787_v52 }
 0xc16   : > { %v1800_v3 = vadd.f32 0.09678418, %v1799_v1 }
 0xc18   : > { %v1801_v4 = vmul.f32 %v1800_v3, %v1787_v52 }
 0xc1a   : > { %v1802_v18 = vadd.f32 0.37409195, %v1801_v4  ;;  %v2444_v4 = vld [vmem:[%s3423_s6] ss:$0 sm:$0xff] }
 0xc1c   : > { %v1803_v20 = vmul.f32 %v1802_v18, %v1787_v52 }
 0xc1e   : > { %v1804_v5 = vadd.f32 1.0000237, %v1803_v20 }
 0xc20   : > { %v1805_v9 = vmul.f32 %v1804_v5, %v1787_v52 }
 0xc22   : > { %v1806_v22 = vadd.f32 -1.2655122, %v1805_v9 }
 0xc24   : > { %v1809_v12 = vadd.f32 %v1808_v11, %v1806_v22 }
 0xc26   : > { %v1810_v13 = vmul.f32 1.442695, %v1809_v12 }
 0xc28   : > { %2491 = vpow2.f32 %v1810_v13 }
 0xc2e   : > { %v2492_v14 = vpop.eup %2491 }
 0xc2f   : > { %v1812_v15 = vmul.f32 %v2492_v14, %v1787_v52 }
 0xc31   : > { %v1814_v16 = vsub.f32 2.0, %v1812_v15 }
 0xc33   : > { %v1815_v17 = vsel %vm1813_vm12, %v1812_v15, %v1814_v16 }
 0xc34   : > { %v1816_v19 = vsub.f32 1.0, %v1815_v17 }
 0xc36   : > { %v1817_v23 = vadd.f32 1.0, %v1816_v19 }
 0xc38   : > { %v1818_v24 = vmul.f32 %v1817_v23, %v1769_v7 }
 0xc3a   : > { %v1819_v25 = vpack.c.bf16 %v1818_v24, %v1818_v24 }
 0xc3c   : > { %2273 = vmatmul.msk.bf16.vlgmr.msra.gmra.mxu2 %vm1297_vm13, %v1819_v25 }
 0xcbf   : > { %v1870_v6 = vpop.f32.mrf.mxu2 }
 0xcc0   : > { %v1871_v27 = vadd.f32 %v2440_v26, %v1870_v6 }
 0xcc2   : > { %v1874_v28 = vadd.f32 %v1871_v27, %v3266_v33 }
 0xcc4   : > { %v1879_v29 = vsel %vm800_vm0, %v1874_v28, 0.0 }
 0xcc5   : > { %1880 = vadd.xlane.f32.xlu1 %v1879_v29 }
 0xcc7   : > { %v1872_v30 = vpop.f32.mrf.mxu2 }
 0xd38   : > { %v1881_v31 = vpop.xlane.xlu1 %1880 }
 0xd39   : > { %v1882_v32 = vmul.f32 %v1881_v31, %v3143_v21 }
 0xd3b   : > { %v1883_v34 = vsub.f32 %v1874_v28, %v1882_v32 }
 0xd3d   : > { %v1884_v35 = vmul.f32 %v1883_v34, %v1883_v34 }
 0xd3f   : > { %v1885_v36 = vsel %vm800_vm0, %v1884_v35, 0.0 }
 0xd40   : > { %1886 = vadd.xlane.f32.xlu2 %v1885_v36 }
 0xdb3   : > { %v1887_v37 = vpop.xlane.xlu2 %1886 }
 0xdb4   : > { %v1888_v38 = vmul.f32 %v1887_v37, %v3143_v21 }
 0xdb6   : > { %v1889_v39 = vadd.f32 1e-05, %v1888_v38 }
 0xdb8   : > { %2493 = vrsqrt.f32 %v1889_v39  ;;  %vm1896_vm14 = vweird.f32 %v1889_v39 }
 0xdbe   : > { %v2494_v40 = vpop.eup %2493 }
 0xdbf   : > { %v1891_v41 = vmul.f32 %v2494_v40, %v1889_v39  ;;  %vm1897_vm13 = vweird.f32 %v2494_v40 }
 0xdc0   : > { %vm1898_vm15 = vmor %vm1896_vm14, %vm1897_vm13 }
 0xdc1   : > { %v1892_v33 = vmul.f32 %v2494_v40, %v1891_v41 }
 0xdc3   : > { %v1893_v42 = vmul.f32 0.5, %v1892_v33 }
 0xdc5   : > { %v1894_v44 = vsub.f32 1.5, %v1893_v42 }
 0xdc7   : > { %v1895_v45 = vmul.f32 %v2494_v40, %v1894_v44 }
 0xdc9   : > { %v1899_v47 = vsel %vm1898_vm15, %v2494_v40, %v1895_v45 }
 0xdca   : > { %v1900_v48 = vmul.f32 %v1899_v47, %v1883_v34 }
 0xdcc   : > { %v1904_v50 = vmul.f32 %v2441_v46, %v1900_v48 }
 0xdce   : > { %v1908_v51 = vadd.f32 %v2442_v49, %v1904_v50 }
 0xdd0   : > { %v1911_v43 = vsel %vm800_vm0, %v1908_v51, 0.0 }
 0xdd1   : > { %1912 = vadd.xlane.f32.xlu0 %v1911_v43 }
 0xe44   : > { %v1913_v52 = vpop.xlane.xlu0 %1912 }
 0xe45   : > { %v1914_v53 = vmul.f32 %v1913_v52, %v3143_v21 }
 0xe47   : > { %v1915_v54 = vsub.f32 %v1908_v51, %v1914_v53 }
 0xe49   : > { %v1916_v55 = vmul.f32 %v1915_v54, %v1915_v54 }
 0xe4b   : > { %v1917_v57 = vsel %vm800_vm0, %v1916_v55, 0.0 }
 0xe4c   : > { %1918 = vadd.xlane.f32.xlu1 %v1917_v57 }
 0xebf   : > { %v1919_v58 = vpop.xlane.xlu1 %1918 }
 0xec0   : > { %v1920_v59 = vmul.f32 %v1919_v58, %v3143_v21 }
 0xec2   : > { %v1921_v61 = vadd.f32 1e-05, %v1920_v59 }
 0xec4   : > { %2495 = vrsqrt.f32 %v1921_v61  ;;  %vm1928_vm3 = vweird.f32 %v1921_v61 }
 0xeca   : > { %v2496_v56 = vpop.eup %2495 }
 0xecb   : > { %v1923_v60 = vmul.f32 %v2496_v56, %v1921_v61  ;;  %vm1929_vm2 = vweird.f32 %v2496_v56 }
 0xecc   : > { %vm1930_vm4 = vmor %vm1928_vm3, %vm1929_vm2 }
 0xecd   : > { %v1924_v62 = vmul.f32 %v2496_v56, %v1923_v60 }
 0xecf   : > { %v1925_v63 = vmul.f32 0.5, %v1924_v62 }
 0xed1   : > { %v1926_v0 = vsub.f32 1.5, %v1925_v63 }
 0xed3   : > { %v1927_v1 = vmul.f32 %v2496_v56, %v1926_v0 }
 0xed5   : > { %v1931_v21 = vsel %vm1930_vm4, %v2496_v56, %v1927_v1 }
 0xed6   : > { %v1932_v3 = vmul.f32 %v1931_v21, %v1915_v54 }
 0xed8   : > { %v1936_v10 = vmul.f32 %v2443_v2, %v1932_v3 }
 0xeda   : > { %v1940_v18 = vadd.f32 %v2444_v4, %v1936_v10 }
 0xedc   : > { %1941 = vst.msk [vmem:[%s770_s7] sm:$0xff] %vm800_vm0, %v1940_v18 }
 0xedd   : > { %2734 = shalt.err (!%p2731_p9)
}
 0xede   : > { %2333 = dma.vmem_to_hbm [thread:$0]  (%p3005_p5), %s1956_s8, 128, %s1958_s10, %s1943_s1  }
 0xedf PF: > { %s1969_s7 = sand.u32 1, %s2773_s2   ;;  %p3425_p10 = scmp.ge.s32.totalorder %s2785_s27, 2 }
 0xee0   : > { %s1970_s24 = scalar_lea.sflag [#allocation4], %s1969_s7 }
 0xee1   : > { %p2359_p13 = pnand %p3425_p10, %p3009_p6 }
 0xee3   : > { %p2360_p11 = pneg %p2359_p13 }
 0xee5   : > { %2768 = dma.done.wait (%p2360_p11), %s1970_s24, 128  }
 0xee6   : > { %2770 = vsyncadd (%p2360_p11), %s1970_s24, 4294967168  ;;  %s3426_s11 = sld [smem:[#allocation20_spill]]  ;;  %p37_p0 = scmp.ge.s32.totalorder %s2979_s0, 4  }
 0xee7   : > { %s3427_s2 = smov %s2777_s25  ;;  %s3428_s25 = smov %s2781_s26 }
 0xee8   : > { %s3430_s27 = smov %s2979_s0  ;;  %39 = sbr.rel (!%p37_p0) target bundleno = 29 (0x1d), region = 189 }
 0xeec   : > { %s3429_s26 = smov %s3426_s11 }
 0xeed   :  { %1976 = vsyncpa [#allocation3], 1 }
 0xeee   :  { %1978 = vsyncpa [#allocation3 + $0x1], 1 }
 0xeef   :  { %1979 = vsyncpa [#allocation6], 1 }
 0xef0   :  { %1980 = vsyncpa [#allocation9], 1 }
 0xef1   :  { %1981 = vsyncpa [#allocation12], 1 }
 0xef2   :  { %1982 = vsyncpa [#allocation4], 1 }
 0xef3   :  { %1984 = vsyncpa [#allocation4 + $0x1], 1 }

</bundles_post_ra>
